<compile_context>
chip_gen: v5e
topology: v5e:2x2
jax: 0.10.0
libtpu: 0.0.40
codegen_flags: <defaults>
</compile_context>

<pallas_src>
from functools import partial

import jax
import jax.numpy as jnp
from jax.experimental import pallas as pl
from jax.experimental.pallas import tpu as pltpu


# ------------------------------ tiling helper ------------------------------ #
def _pick_tile(dim, cap, quantum):
    """Largest tile <= cap that divides `dim` and respects TPU tiling quanta.

    Returns `dim` itself when dim <= cap (a full-extent block is always legal).
    """
    if dim <= cap:
        return dim
    t = (cap // quantum) * quantum
    while t >= quantum:
        if dim % t == 0:
            return t
        t -= quantum
    return dim  # fall back to untiled along this axis


# ------------------------------ linear kernel ------------------------------ #
def _linear_kernel(x_ref, w_ref, b_ref, o_ref, acc_ref):
    @pl.when(pl.program_id(2) == 0)
    def _():
        acc_ref[...] = jnp.zeros_like(acc_ref)

    acc_ref[...] += jnp.dot(x_ref[...], w_ref[...],
                            preferred_element_type=jnp.float32)

    @pl.when(pl.program_id(2) == pl.num_programs(2) - 1)
    def _():
        o_ref[...] = (acc_ref[...] + b_ref[...].astype(jnp.float32)).astype(o_ref.dtype)


def linear(x, w, b, *, tm_cap=256, tn_cap=256, tk_cap=512):
    """y = x @ w + b.  x:[M,K], w:[K,N] (already transposed), b:[N] -> [M,N]."""
    M, K = x.shape
    K2, N = w.shape
    assert K == K2
    tm = _pick_tile(M, tm_cap, 8)
    tn = _pick_tile(N, tn_cap, 128)
    tk = _pick_tile(K, tk_cap, 128)
    b2 = b.reshape(1, N)
    grid = (M // tm, N // tn, K // tk)
    return pl.pallas_call(
        _linear_kernel,
        grid=grid,
        in_specs=[
            pl.BlockSpec((tm, tk), lambda i, j, k: (i, k)),
            pl.BlockSpec((tk, tn), lambda i, j, k: (k, j)),
            pl.BlockSpec((1, tn), lambda i, j, k: (0, j)),
        ],
        out_specs=pl.BlockSpec((tm, tn), lambda i, j, k: (i, j)),
        out_shape=jax.ShapeDtypeStruct((M, N), x.dtype),
        scratch_shapes=[pltpu.VMEM((tm, tn), jnp.float32)],
        compiler_params=pltpu.CompilerParams(
            dimension_semantics=("parallel", "parallel", "arbitrary")),
    )(x, w, b2)


# ----------------------- flash attention (all heads) ----------------------- #
def _flash_attn_kernel(q_ref, k_ref, v_ref, cq_ref, sq_ref, ck_ref, sk_ref,
                       mask_ref, o_ref, m_sc, l_sc, acc_sc,
                       *, num_heads, head_dim, scale):
    ki = pl.program_id(2)

    @pl.when(ki == 0)
    def _():
        m_sc[...] = jnp.full_like(m_sc, -jnp.inf)
        l_sc[...] = jnp.zeros_like(l_sc)
        acc_sc[...] = jnp.zeros_like(acc_sc)

    # RoPE tables (sin already carries the rotate_half sign on its first half).
    cq = cq_ref[...].astype(jnp.float32)          # [tq, D]
    sq = sq_ref[...].astype(jnp.float32)
    ck = ck_ref[...].astype(jnp.float32)          # [tk, D]
    sk = sk_ref[...].astype(jnp.float32)
    mask = mask_ref[0].astype(jnp.float32)        # [1, tk] additive key mask

    q_all = q_ref[0]                              # [tq, H]  (lane-dense)
    k_all = k_ref[0]                              # [tk, H]
    v_all = v_ref[0]                              # [tk, H]
    dt = q_all.dtype
    D = head_dim

    for h in range(num_heads):                    # static unroll over heads
        qh = q_all[:, h * D:(h + 1) * D].astype(jnp.float32)   # [tq, D]
        kh = k_all[:, h * D:(h + 1) * D].astype(jnp.float32)   # [tk, D]
        vh = v_all[:, h * D:(h + 1) * D]                       # [tk, D]

        # x*cos + rotate_half(x)*sin  ==  x*cos + roll(x, D/2)*sin_signed
        qh = qh * cq + pltpu.roll(qh, shift=D // 2, axis=1) * sq
        kh = kh * ck + pltpu.roll(kh, shift=D // 2, axis=1) * sk

        # QK^T in the input dtype with f32 accumulation; softmax math in f32.
        s = jnp.dot(qh.astype(dt), kh.astype(dt).T,
                    preferred_element_type=jnp.float32) * scale
        s = s + mask                                           # [tq, tk]

        m_prev = m_sc[h]                                       # [tq, 1]
        l_prev = l_sc[h]
        a_prev = acc_sc[h]                                     # [tq, D]

        m_new = jnp.maximum(m_prev, jnp.max(s, axis=-1, keepdims=True))
        alpha = jnp.exp(m_prev - m_new)
        p = jnp.exp(s - m_new)

        l_sc[h] = alpha * l_prev + jnp.sum(p, axis=-1, keepdims=True)
        acc_sc[h] = alpha * a_prev + jnp.dot(p.astype(dt), vh,
                                             preferred_element_type=jnp.float32)
        m_sc[h] = m_new

    @pl.when(ki == pl.num_programs(2) - 1)
    def _():
        # Lane-dense merged-head output [tq, NH*D] written in one store.
        parts = [acc_sc[h] / l_sc[h] for h in range(num_heads)]
        o_ref[0] = jnp.concatenate(parts, axis=-1).astype(o_ref.dtype)


def flash_attention(qkv, cos, sin_signed, key_mask, num_heads, head_dim):
    """qkv:[B,S,3H] (Wqkv output), cos/sin_signed:[S,D], key_mask:[B,S] additive.

    Returns merged-head attention output [B, S, H]."""
    B, S, H3 = qkv.shape
    H = num_heads * head_dim
    assert H3 == 3 * H
    tq = _pick_tile(S, 128, 8)
    tk = S if S <= 128 else _pick_tile(S, 128, 128)
    grid = (B, S // tq, S // tk)
    scale = head_dim ** (-0.5)
    mask3 = key_mask.reshape(B, 1, S).astype(jnp.float32)

    kernel = partial(_flash_attn_kernel, num_heads=num_heads,
                     head_dim=head_dim, scale=scale)
    return pl.pallas_call(
        kernel,
        grid=grid,
        in_specs=[
            # q / k / v column-blocks of the same qkv buffer (no XLA transpose).
            pl.BlockSpec((1, tq, H), lambda b, qi, ki: (b, qi, 0)),
            pl.BlockSpec((1, tk, H), lambda b, qi, ki: (b, ki, 1)),
            pl.BlockSpec((1, tk, H), lambda b, qi, ki: (b, ki, 2)),
            pl.BlockSpec((tq, head_dim), lambda b, qi, ki: (qi, 0)),   # cos (q rows)
            pl.BlockSpec((tq, head_dim), lambda b, qi, ki: (qi, 0)),   # sin  (q rows)
            pl.BlockSpec((tk, head_dim), lambda b, qi, ki: (ki, 0)),   # cos (k rows)
            pl.BlockSpec((tk, head_dim), lambda b, qi, ki: (ki, 0)),   # sin  (k rows)
            pl.BlockSpec((1, 1, tk), lambda b, qi, ki: (b, 0, ki)),    # key mask row
        ],
        out_specs=pl.BlockSpec((1, tq, H), lambda b, qi, ki: (b, qi, 0)),
        out_shape=jax.ShapeDtypeStruct((B, S, H), qkv.dtype),
        scratch_shapes=[
            pltpu.VMEM((num_heads, tq, 1), jnp.float32),        # m
            pltpu.VMEM((num_heads, tq, 1), jnp.float32),        # l
            pltpu.VMEM((num_heads, tq, head_dim), jnp.float32), # acc
        ],
        compiler_params=pltpu.CompilerParams(
            dimension_semantics=("parallel", "parallel", "arbitrary")),
    )(qkv, qkv, qkv, cos, sin_signed, cos, sin_signed, mask3)


# --------------------------- full module forward ---------------------------- #
def scmodernbert_attention_forward(hidden_states, params, cos, sin, key_mask,
                                   num_heads, head_dim):
    """params hold pre-transposed weights: Wqkv_wT [H,3H], Wo_wT [H,H]."""
    B, S, H = hidden_states.shape
    x2d = hidden_states.reshape(B * S, H)

    qkv = linear(x2d, params["Wqkv_wT"], params["Wqkv_b"])     # [B*S, 3H]
    qkv = qkv.reshape(B, S, 3 * H)                             # free reshape

    # Fold the rotate_half sign into sin once: rotate_half(x) = roll(x,D/2)*sign.
    sign = jnp.concatenate([-jnp.ones(head_dim // 2, cos.dtype),
                            jnp.ones(head_dim // 2, cos.dtype)])
    sin_signed = sin * sign

    # attention_dropout = 0.0 and eval mode -> dropout / out_drop are identity.
    attn = flash_attention(qkv, cos, sin_signed, key_mask,
                           num_heads, head_dim)                # [B, S, H] merged heads

    out = linear(attn.reshape(B * S, H), params["Wo_wT"], params["Wo_b"])
    return out.reshape(B, S, H)


# --------------------------- reference (plain JAX) -------------------------- #
def reference_forward(hidden_states, params, cos, sin, key_mask, num_heads, head_dim):
    B, S, H = hidden_states.shape
    qkv = hidden_states @ params["Wqkv_wT"] + params["Wqkv_b"]
    qkv = qkv.reshape(B, S, 3, num_heads, head_dim)
    qkv = jnp.transpose(qkv, (0, 3, 2, 1, 4))          # [B, NH, 3, S, D]
    q, k, v = qkv[:, :, 0], qkv[:, :, 1], qkv[:, :, 2]

    def rot_half(x):
        x1, x2 = x[..., :head_dim // 2], x[..., head_dim // 2:]
        return jnp.concatenate((-x2, x1), axis=-1)

    c = cos[None, None]
    s = sin[None, None]
    q = q * c + rot_half(q) * s
    k = k * c + rot_half(k) * s
    scores = jnp.einsum("bhqd,bhkd->bhqk", q, k) * head_dim ** (-0.5)
    scores = scores + key_mask[:, None, None, :]
    p = jax.nn.softmax(scores.astype(jnp.float32), axis=-1).astype(q.dtype)
    o = jnp.einsum("bhqk,bhkd->bhqd", p, v)
    o = jnp.transpose(o, (0, 2, 1, 3)).reshape(B, S, H)
    return o @ params["Wo_wT"] + params["Wo_b"]


if __name__ == "__main__":
    # Make the XLA-side reference use full-precision f32 matmuls for comparison.
    jax.config.update("jax_default_matmul_precision", "highest")

    # Small config: hidden=128, num_heads=4 (head_dim=32), batch=2, seq=256.
    # seq=256 exercises the multi-tile flash path (tq=tk=128 -> grid (2,2,2)).
    B, S, H, NH = 2, 256, 128, 4
    HD = H // NH
    rope_theta = 10000.0

    key = jax.random.PRNGKey(0)
    k1, k2, k3, k4, k5 = jax.random.split(key, 5)
    hidden_states = jax.random.normal(k1, (B, S, H), jnp.float32)

    # nn.Linear stores weight [out, in]; pre-transpose ONCE at param-prep time
    # so the forward pass never materializes a weight transpose.
    Wqkv = 0.02 * jax.random.normal(k2, (3 * H, H), jnp.float32)
    bqkv = 0.02 * jax.random.normal(k3, (3 * H,), jnp.float32)
    Wo = 0.02 * jax.random.normal(k4, (H, H), jnp.float32)
    bo = 0.02 * jax.random.normal(k5, (H,), jnp.float32)
    params = {"Wqkv_wT": Wqkv.T, "Wqkv_b": bqkv, "Wo_wT": Wo.T, "Wo_b": bo}

    # Default RoPE ("default" rope_type, attention_scaling = 1.0); positions 0..S-1.
    inv_freq = 1.0 / (rope_theta ** (jnp.arange(0, HD, 2, dtype=jnp.float32) / HD))
    pos = jnp.arange(S, dtype=jnp.float32)
    freqs = pos[:, None] * inv_freq[None, :]                   # [S, HD/2]
    emb = jnp.concatenate([freqs, freqs], axis=-1)             # [S, HD]
    cos = jnp.cos(emb)
    sin = jnp.sin(emb)

    # Additive key-padding mask [B, S] (0 = attend). Global attention layer
    # only needs a row mask; the dense [B,1,S,S] matrix is never built.
    key_mask = jnp.zeros((B, S), jnp.float32)

    out = scmodernbert_attention_forward(hidden_states, params, cos, sin,
                                         key_mask, NH, HD)
    out = jax.block_until_ready(out)

    ref = reference_forward(hidden_states, params, cos, sin, key_mask, NH, HD)
    assert out.shape == (B, S, H)
    err = float(jnp.max(jnp.abs(out - ref)))
    assert jnp.allclose(out, ref, atol=2e-4, rtol=2e-4), f"mismatch vs reference: {err}"
    print("KERNEL_OK")
</pallas_src>

<mosaic_0001>
module attributes {stable_mosaic.version = 11 : i64} {
  func.func @_linear_kernel(%arg0: i32, %arg1: i32, %arg2: i32, %arg3: memref<256x128xf32, #tpu.memory_space<vmem>>, %arg4: memref<128x128xf32, #tpu.memory_space<vmem>>, %arg5: memref<1x128xf32, #tpu.memory_space<vmem>>, %arg6: memref<256x128xf32, #tpu.memory_space<vmem>>, %arg7: memref<256x128xf32, #tpu.memory_space<vmem>>) attributes {dimension_semantics = [#tpu.dimension_semantics<parallel>, #tpu.dimension_semantics<parallel>, #tpu.dimension_semantics<arbitrary>], iteration_bounds = array<i64: 2, 3, 1>, scalar_prefetch = 0 : i64, scratch_operands = 1 : i64, tpu.core_type = #tpu.core_type<tc>, window_params = [{transform_indices = @transform_0, window_bounds = array<i64: 256, 128>}, {transform_indices = @transform_1, window_bounds = array<i64: 128, 128>}, {transform_indices = @transform_2, window_bounds = array<i64: 1, 128>}, {transform_indices = @transform_3, window_bounds = array<i64: 256, 128>}]} {
    %c0_i32 = arith.constant 0 : i32
    %0 = arith.cmpi eq, %arg2, %c0_i32 : i32
    %1 = arith.extui %0 : i1 to i32
    %c0_i32_0 = arith.constant 0 : i32
    %2 = arith.cmpi ne, %1, %c0_i32_0 : i32
    scf.if %2 {
      %cst_10 = arith.constant 0.000000e+00 : f32
      %12 = vector.broadcast %cst_10 : f32 to vector<256x128xf32>
      %c0_11 = arith.constant 0 : index
      %c0_12 = arith.constant 0 : index
      %13 = vector.load %arg7[%c0_11, %c0_12] : memref<256x128xf32, #tpu.memory_space<vmem>>, vector<256x128xf32>
      tpu.vector_store %arg7[%c0_11, %c0_12], %12 {strides = array<i32>} : memref<256x128xf32, #tpu.memory_space<vmem>>, vector<256x128xf32>,
    } else {
    }
    %c0 = arith.constant 0 : index
    %c0_1 = arith.constant 0 : index
    %3 = vector.load %arg7[%c0, %c0_1] : memref<256x128xf32, #tpu.memory_space<vmem>>, vector<256x128xf32>
    %c0_2 = arith.constant 0 : index
    %c0_3 = arith.constant 0 : index
    %4 = vector.load %arg3[%c0_2, %c0_3] : memref<256x128xf32, #tpu.memory_space<vmem>>, vector<256x128xf32>
    %c0_4 = arith.constant 0 : index
    %c0_5 = arith.constant 0 : index
    %5 = vector.load %arg4[%c0_4, %c0_5] : memref<128x128xf32, #tpu.memory_space<vmem>>, vector<128x128xf32>
    %cst = arith.constant dense<0.000000e+00> : vector<256x128xf32>
    %6 = tpu.matmul %4, %5, %cst {dimension_numbers = #tpu.dot_dimension_numbers<[1], [0], [0], [1], [0, 0, 1, 1], [], []>, precision = #tpu.contract_precision<fp32>} : vector<256x128xf32>, vector<128x128xf32>, vector<256x128xf32> -> vector<256x128xf32>
    %7 = arith.addf %3, %6 : vector<256x128xf32>
    %c0_6 = arith.constant 0 : index
    %c0_7 = arith.constant 0 : index
    %8 = vector.load %arg7[%c0_6, %c0_7] : memref<256x128xf32, #tpu.memory_space<vmem>>, vector<256x128xf32>
    tpu.vector_store %arg7[%c0_6, %c0_7], %7 {strides = array<i32>} : memref<256x128xf32, #tpu.memory_space<vmem>>, vector<256x128xf32>,
    %c0_i32_8 = arith.constant 0 : i32
    %9 = arith.cmpi eq, %arg2, %c0_i32_8 : i32
    %10 = arith.extui %9 : i1 to i32
    %c0_i32_9 = arith.constant 0 : i32
    %11 = arith.cmpi ne, %10, %c0_i32_9 : i32
    scf.if %11 {
      %c0_10 = arith.constant 0 : index
      %c0_11 = arith.constant 0 : index
      %12 = vector.load %arg7[%c0_10, %c0_11] : memref<256x128xf32, #tpu.memory_space<vmem>>, vector<256x128xf32>
      %c0_12 = arith.constant 0 : index
      %c0_13 = arith.constant 0 : index
      %13 = vector.load %arg5[%c0_12, %c0_13] : memref<1x128xf32, #tpu.memory_space<vmem>>, vector<1x128xf32>
      %14 = vector.broadcast %13 : vector<1x128xf32> to vector<256x128xf32>
      %15 = arith.addf %12, %14 : vector<256x128xf32>
      %c0_14 = arith.constant 0 : index
      %c0_15 = arith.constant 0 : index
      %16 = vector.load %arg6[%c0_14, %c0_15] : memref<256x128xf32, #tpu.memory_space<vmem>>, vector<256x128xf32>
      tpu.vector_store %arg6[%c0_14, %c0_15], %15 {strides = array<i32>} : memref<256x128xf32, #tpu.memory_space<vmem>>, vector<256x128xf32>,
    } else {
    }
    return
  }
  func.func @transform_0(%arg0: i32, %arg1: i32, %arg2: i32) -> (i32, i32) {
    %c0_i32 = arith.constant 0 : i32
    return %arg0, %arg2 : i32, i32
  }
  func.func @transform_1(%arg0: i32, %arg1: i32, %arg2: i32) -> (i32, i32) {
    %c0_i32 = arith.constant 0 : i32
    return %arg2, %arg1 : i32, i32
  }
  func.func @transform_2(%arg0: i32, %arg1: i32, %arg2: i32) -> (i32, i32) {
    %c0_i32 = arith.constant 0 : i32
    %c0_i32_0 = arith.constant 0 : i32
    return %c0_i32, %arg1 : i32, i32
  }
  func.func @transform_3(%arg0: i32, %arg1: i32, %arg2: i32) -> (i32, i32) {
    %c0_i32 = arith.constant 0 : i32
    return %arg0, %arg1 : i32, i32
  }
}

</mosaic_0001>

<bundles_post_ra>
// kernel: tpu_custom_call.1
= control target key start
LH: loop header
LB: loop body
LE: loop exit
PB: predicated region body
PF: predicated region fallthrough
CT: control target
= control target key end

     0   :  { %s3790_s0 = inlined_call_operand.hbm [shape: f32[512,128], index: 0, kind: input, shape index: {}]   ;;  %s3791_s1 = inlined_call_operand.hbm [shape: f32[128,384], index: 1, kind: input, shape index: {}]   ;;  %s3792_s2 = inlined_call_operand.hbm [shape: f32[1,384], index: 2, kind: input, shape index: {}]   ;;  %s3793_s3 = inlined_call_operand.hbm [shape: f32[512,384], index: 3, kind: output, shape index: {}]  }
   0x1   :  { %3871 = sst [smem:[#allocation54_spill]] %s3791_s1 }
   0x2   :  { %3872 = sst [smem:[#allocation55_spill]] %s3793_s3 }
   0x3   :  { %8 = vsyncpa [#allocation4], 0 }
   0x4   :  { %10 = vsyncpa [#allocation4 + $0x1], 0 }
   0x5   :  { %11 = vsyncpa [#allocation7], 0 }
   0x6   :  { %13 = vsyncpa [#allocation7 + $0x1], 0 }
   0x7   :  { %14 = vsyncpa [#allocation5], 0 }
   0x8   :  { %16 = vsyncpa [#allocation5 + $0x1], 0  ;;  %s2495_s12 = smov 0   ;;  %s2497_s13 = smov 0  }
   0x9   :  { %s2499_s14 = smov 0   ;;  %s2501_s15 = smov 0  }
   0xa   :  { %s2503_s16 = smov 0   ;;  %s2505_s17 = smov 0  }
   0xb   :  { %s2507_s18 = smov 0   ;;  %s2509_s19 = smov 0  }
   0xc   :  { %s2511_s20 = smov 0   ;;  %s2513_s21 = smov 0  }
   0xd   :  { %s2515_s22 = smov 0   ;;  %s2517_s23 = smov 0  }
   0xe   :  { %s2519_s24 = smov 0   ;;  %s2521_s25 = smov 0  }
   0xf LB: > { %3873 = sst [smem:[#allocation13_spill]] %s2415_s12  ;;  %s37_s26 = sadd.s32 1, %s2459_s23  ;;  %s2467_s25 = sphi %s2521_s25, %s22_s25   ;;  %s2463_s24 = sphi %s2519_s24, %s4011_s24   ;;  %s2459_s23 = sphi %s2517_s23, %s4020_s23   ;;  %s2455_s22 = sphi %s2515_s22, %s4009_s22   ;;  %s2451_s21 = sphi %s2513_s21, %s4019_s21   ;;  %s2447_s20 = sphi %s2511_s20, %s4008_s20   ;;  %s2443_s19 = sphi %s2509_s19, %s4018_s19   ;;  %s2439_s18 = sphi %s2507_s18, %s4017_s18   ;;  %s2435_s17 = sphi %s2505_s17, %s4016_s17   ;;  %s2431_s16 = sphi %s2503_s16, %s4015_s16   ;;  %s2427_s15 = sphi %s2501_s15, %s4014_s15   ;;  %s2423_s14 = sphi %s2499_s14, %s4005_s14   ;;  %s2419_s13 = sphi %s2497_s13, %s4013_s13   ;;  %s2415_s12 = sphi %s2495_s12, %s4012_s12  }
  0x10   : > { %3874 = sst [smem:[#allocation14_spill]] %s2423_s14  ;;  %p58_p0 = scmp.eq.s32.totalorder %s2467_s25, 0 }
  0x11   : > { %3875 = sst [smem:[#allocation15_spill]] %s2447_s20  ;;  %p2569_p1 = scmp.ge.s32.totalorder %s37_s26, 3 }
  0x12   : > { %3876 = sst [smem:[#allocation16_spill]] %s2451_s21  ;;  %p85_p2 = scmp.ne.s32.totalorder %s2435_s17, %s2431_s16 }
  0x13   : > { %3877 = sst [smem:[#allocation17_spill]] %s2455_s22  ;;  %p91_p3 = scmp.ne.s32.totalorder %s2431_s16, %s2427_s15 }
  0x14   : > { %3878 = sst [smem:[#allocation18_spill]] %s2463_s24  ;;  %p2106_p4 = scmp.lt.s32.totalorder %s2467_s25, 6 }
  0x15   : > { %p87_p5 = por %p85_p2, %p58_p0  ;;  %s192_s29 = sand.u32 1, %s2467_s25  }
  0x16   : > { %s3794_s30 = sand.u32 1, %s2435_s17   ;;  %s2039_s5 = sshll.u32 %s2459_s23, 3 }
  0x17   : > { %s2038_s4 = sshll.u32 %s3794_s30, 7  ;;  %s3880_s1 = sld [smem:[#allocation54_spill]] }
  0x18   : > { %s196_s10 = scalar_lea.vmem [#allocation6], %s2038_s4  ;;  %p2591_p6 = pnand %p2106_p4, %p87_p5 }
  0x19   : > { %s206_s11 = sshll.u32 %s196_s10, 4  ;;  %p2040_p7 = scmp.ge.s32.totalorder %s2467_s25, 1  ;;  %s207_s11 = int_to_ptr.vmem [resolvable:$true] %s206_s11 }
  0x1a   : > { %p231_p8 = scmp.lt.s32.totalorder %s2467_s25, 7  ;;  %s2597_s4 = scalar_lea.sflag [#allocation7], %s192_s29 }
  0x1b   : > { %s3795_s6 = smov 128   ;;  %s3796_s7 = smov 8  }
  0x1c   : > { %p2604_p9 = pnand %p2040_p7, %p231_p8  ;;  %s2609_s10 = sadd.s32 4294967295, %s2467_s25  }
  0x1d   : > { %s203_s8 = scalar_lea.hbm %s3880_s1, %s2039_s5  ;;  %s2469_s5 = smov 384  }
  0x1e   : > { %s204_s9 = sshll.u32 %s203_s8, 4  ;;  %s2032_s29 = sadd.s32 4294967294, %s2467_s25   ;;  %s205_s9 = int_to_ptr.hbm [resolvable:$true] %s204_s9 }
  0x1f   : > { %2098 = dma.hbm_to_vmem [thread:$0]  (!%p2591_p6), %s205_s9, 2048, %s207_s11, %s2597_s4, %s2469_s5, %s3795_s6, %s3796_s7  }
  0x20   : > { %s4022_s26 = smov (%p2569_p1, %s37_s26), 0  ;;  %s41_s28 = sadd.s32 1, %s2463_s24 }
  0x21   : > { %3883 = sst [smem:[#allocation19_spill]] %s4022_s26  ;;  %s50_s9 = sadd.s32 1, %s2447_s20 }
  0x22   : > { %s4024_s28 = smov (!%p2569_p1, %s41_s28), %s2463_s24  ;;  %p57_p10 = scmp.ne.s32.totalorder %s2447_s20, %s2443_s19 }
  0x23   : > { %p63_p11 = scmp.ne.s32.totalorder %s2443_s19, %s2439_s18  ;;  %p43_p12 = scmp.ge.s32.totalorder %s4024_s28, 2 }
  0x24   : > { %p64_p13 = scmp.eq.s32.totalorder %s2609_s10, 0  ;;  %p2630_p2 = por %p58_p0, %p57_p10 }
  0x25   : > { %s74_s5 = ssub.s32 %s2459_s23, %s4022_s26  ;;  %s4026_s28 = smov (%p43_p12, %s4024_s28), 0 }
  0x26   : > { %3885 = sst [smem:[#allocation20_spill]] %s4026_s28  ;;  %p2638_p1 = por %p64_p13, %p63_p11 }
  0x27   : > { %p76_p5 = scmp.eq.s32.totalorder %s74_s5, 0  ;;  %s45_s18 = ssub.s32 %s2463_s24, %s4026_s28 }
  0x28   : > { %p2647_p7 = por %p91_p3, %p64_p13  ;;  %p48_p0 = scmp.eq.s32.totalorder %s45_s18, 0 }
  0x29   : > { %s129_s7 = sor.u32 %s74_s5, %s45_s18  ;;  %s3888_s1 = sadd.s32 1, %s2435_s17 }
  0x2a   : > { %s2654_s26 = scalar_select %p76_p5, %s2435_s17, %s3888_s1  }
  0x2b   : > { %s2657_s3 = scalar_select %p48_p0, %s2447_s20, %s50_s9  }
  0x2c   : > { %3889 = sst [smem:[#allocation21_spill]] %s2654_s26  ;;  %p130_p8 = scmp.eq.s32.totalorder %s129_s7, 0 }
  0x2d   : > { %3890 = sst [smem:[#allocation22_spill]] %s2657_s3  ;;  %s132_s21 = sadd.s32 1, %s2423_s14 }
  0x2e   : > { %p142_p10 = scmp.ne.s32.totalorder %s2423_s14, %s2419_s13  ;;  %p143_p11 = scmp.eq.s32.totalorder %s2609_s10, 5 }
  0x2f   : > { %s2664_s15 = scalar_select %p130_p8, %s2423_s14, %s132_s21  }
  0x30   : > { %p2666_p3 = por %p143_p11, %p142_p10  ;;  %p148_p12 = scmp.ne.s32.totalorder %s2419_s13, %s2415_s12 }
  0x31   : > { %3891 = sst [smem:[#allocation23_spill]] %s2664_s15  ;;  %p149_p13 = scmp.eq.s32.totalorder %s2032_s29, 5 }
  0x32   : > { %s3892_s28 = scalar_select %p2666_p3, 1, 0 }
  0x33   : > { %s169_s1 = sand.u32 1, %s2447_s20   ;;  %p2673_p5 = por %p149_p13, %p148_p12 }
  0x34   : > { %3893 = sst [smem:[#allocation24_spill]] %s3892_s28  ;;  %s2035_s5 = sshll.u32 %s169_s1, 8 }
  0x35   : > { %s3894_s9 = scalar_select %p2673_p5, 1, 0 }
  0x36   : > { %s2050_s7 = sshll.u32 %s2463_s24, 8  ;;  %s173_s18 = scalar_lea.vmem [#allocation3], %s2035_s5 }
  0x37   : > { %3895 = sst [smem:[#allocation25_spill]] %s3894_s9  ;;  %s182_s3 = sshll.u32 %s173_s18, 4  ;;  %s183_s3 = int_to_ptr.vmem [resolvable:$true] %s182_s3 }
  0x38   : > { %s179_s15 = scalar_lea.hbm %s3790_s0, %s2050_s7  ;;  %p2093_p0 = pnand %p2106_p4, %p2630_p2 }
  0x39   : > { %s180_s14 = sshll.u32 %s179_s15, 4  ;;  %s222_s12 = scalar_lea.hbm %s3792_s2, %s2459_s23  ;;  %s181_s14 = int_to_ptr.hbm [resolvable:$true] %s180_s14 }
  0x3a   : > { %s170_s9 = scalar_lea.sflag [#allocation4], %s169_s1  ;;  %s3896_s24 = smov 8  }
  0x3b   : > { %s3897_s28 = smov 128   ;;  %s224_s5 = sshll.u32 %s222_s12, 4  ;;  %s225_s5 = int_to_ptr.hbm [resolvable:$true] %s224_s5 }
  0x3c   : > { %2095 = dma.hbm_to_vmem [thread:$0]  (!%p2093_p0), %s181_s14, 4096, %s183_s3, %s170_s9, %s3897_s28, %s3897_s28, %s3896_s24  }
  0x3d   : > { %s3898_s18 = sand.u32 1, %s2435_s17   ;;  %235 = sbr.rel (%p2604_p9) target bundleno = 637 (0x27d), region = 32 }
  0x3e   : > { %s219_s22 = scalar_lea.vmem [#allocation8], %s3898_s18 }
  0x3f   : > { %s226_s26 = sshll.u32 %s219_s22, 4  ;;  %s227_s26 = int_to_ptr.vmem [resolvable:$true] %s226_s26 }
  0x40   : > { %2101 = dma.hbm_to_vmem [thread:$0]  (!%p2591_p6), %s225_s5, 16, %s227_s26, %s2597_s4  }
  0x42   : > { %s237_s20 = sand.u32 1, %s2443_s19  }
  0x43   : > { %s2041_s11 = sshll.u32 %s237_s20, 8  ;;  %s238_s15 = scalar_lea.sflag [#allocation4], %s237_s20 }
  0x44   : > { %s2700_s1 = scalar_lea.vmem [#allocation3], %s2041_s11 }
  0x45   : > { %2402 = dma.done.wait (%p2638_p1), %s238_s15, 4096  }
  0x46   : > { %2404 = vsyncadd (%p2638_p1), %s238_s15, 4294963200  ;;  %s247_s3 = sand.u32 1, %s2609_s10   ;;  %s249_s12 = sand.u32 1, %s2431_s16  }
  0x47   : > { %s2042_s14 = sshll.u32 %s249_s12, 7  ;;  %s248_s22 = scalar_lea.sflag [#allocation7], %s247_s3 }
  0x48   : > { %s2710_s24 = scalar_lea.vmem [#allocation6], %s2042_s14 }
  0x49   : > { %2406 = dma.done.wait (%p2647_p7), %s248_s22, 2064  }
  0x4a   : > { %2408 = vsyncadd (%p2647_p7), %s248_s22, 4294965232  ;;  %v411_v0 = vld [vmem:[%s2710_s24 + $0x78] sm:$0xff]  ;;  %v410_v1 = vld [vmem:[%s2710_s24 + $0x70] sm:$0xff]  ;;  %s3359_s28 = scalar_lea.vmem [#allocation8], %s249_s12  ;;  %s290_s30 = sand.u32 1, %s2419_s13  }
  0x4b   : > { %v409_v2 = vld [vmem:[%s2710_s24 + $0x68] sm:$0xff]  ;;  %v2719_v3 = vand.u32 4294901760, %v411_v0  ;;  %v2721_v4 = vand.u32 4294901760, %v410_v1  ;;  %v408_v6 = vld [vmem:[%s2710_s24 + $0x60] sm:$0xff]  ;;  %v407_v7 = vld [vmem:[%s2710_s24 + $0x58] sm:$0xff]  ;;  %s2043_s4 = sshll.u32 %s290_s30, 8 }
  0x4c   : > { %v2723_v5 = vand.u32 4294901760, %v409_v2  ;;  %v406_v8 = vld [vmem:[%s2710_s24 + $0x50] sm:$0xff]  ;;  %v2728_v9 = vand.u32 4294901760, %v408_v6  ;;  %v2730_v10 = vand.u32 4294901760, %v407_v7  ;;  %v405_v12 = vld [vmem:[%s2710_s24 + $0x48] sm:$0xff]  ;;  %v404_v13 = vld [vmem:[%s2710_s24 + $0x40] sm:$0xff] }
  0x4d   : > { %v2732_v11 = vand.u32 4294901760, %v406_v8  ;;  %2051 = vmatpush.msra.mxu2 %v2719_v3  ;;  %v2738_v14 = vsub.f32 %v411_v0, %v2719_v3  ;;  %v2741_v15 = vsub.f32 %v410_v1, %v2721_v4  ;;  %413 = vmatpush.msra.mxu0 %v2719_v3  ;;  %v403_v17 = vld [vmem:[%s2710_s24 + $0x38] sm:$0xff]  ;;  %v2748_v18 = vand.u32 4294901760, %v405_v12  ;;  %v402_v25 = vld [vmem:[%s2710_s24 + $0x30] sm:$0xff]  ;;  %v401_v33 = vld [vmem:[%s2710_s24 + $0x28] sm:$0xff]  ;;  %s3542_s6 = scalar_lea.vmem [#allocation9], %s2043_s4 }
  0x4e   : > { %v2744_v16 = vsub.f32 %v409_v2, %v2723_v5  ;;  %v2751_v19 = vsub.f32 %v408_v6, %v2728_v9  ;;  %v2754_v20 = vsub.f32 %v407_v7, %v2730_v10  ;;  %v2760_v24 = vand.u32 4294901760, %v404_v13  ;;  %v400_v42 = vld [vmem:[%s2710_s24 + $0x20] sm:$0xff]  ;;  %v399_v49 = vld [vmem:[%s2710_s24 + $0x18] sm:$0xff]  ;;  %v398_v55 = vld [vmem:[%s2710_s24 + $0x10] sm:$0xff]  ;;  %s3994_s8 = sld [smem:[#allocation17_spill]]  ;;  %s1896_s20 = sshll.u32 %s3542_s6, 4  ;;  %s1897_s20 = int_to_ptr.vmem [resolvable:$true] %s1896_s20 }
  0x4f   : > { %2052 = vmatpush.msra.mxu2 %v2721_v4  ;;  %v703_v21 = vand.u32 4294901760, %v2738_v14  ;;  %v709_v22 = vand.u32 4294901760, %v2741_v15  ;;  %415 = vmatpush.msra.mxu0 %v2721_v4  ;;  %v2765_v27 = vand.u32 4294901760, %v403_v17  ;;  %v2768_v28 = vsub.f32 %v406_v8, %v2732_v11  ;;  %v380_v47 = vld [vmem:[%s2700_s1 + $0x80] sm:$0xff]  ;;  %v397_v62 = vld [vmem:[%s2710_s24 + $0x8] sm:$0xff]  ;;  %s3996_s10 = sld [smem:[#allocation16_spill]] }
  0x50   : > { %v715_v23 = vand.u32 4294901760, %v2744_v16  ;;  %v721_v26 = vand.u32 4294901760, %v2751_v19  ;;  %v727_v32 = vand.u32 4294901760, %v2754_v20  ;;  %v2786_v35 = vand.u32 4294901760, %v402_v25  ;;  %v396_v2 = vld [vmem:[%s2710_s24] sm:$0xff]  ;;  %s3999_s5 = sld [smem:[#allocation55_spill]] }
  0x51   : > { %2053 = vmatpush.msra.mxu2 %v2723_v5  ;;  %v704_v29 = vsub.f32 %v2738_v14, %v703_v21  ;;  %v710_v30 = vsub.f32 %v2741_v15, %v709_v22  ;;  %417 = vmatpush.msra.mxu0 %v2723_v5  ;;  %v2789_v36 = vsub.f32 %v405_v12, %v2748_v18  ;;  %v3818_v39 = vand.u32 4294901760, %v2768_v28  ;;  %v364_v12 = vld [vmem:[%s2700_s1] sm:$0xff]  ;;  %s1882_s15 = scalar_lea.sflag [#allocation5], %s290_s30 }
  0x52   : > { %v716_v31 = vsub.f32 %v2744_v16, %v715_v23  ;;  %v722_v34 = vsub.f32 %v2751_v19, %v721_v26  ;;  %v2795_v40 = vsub.f32 %v404_v13, %v2760_v24  ;;  %v2797_v41 = vand.u32 4294901760, %v401_v33 }
  0x53   : > { %2054 = vmatpush.msra.mxu2 %v2728_v9  ;;  %v705_v37 = vand.u32 4294901760, %v704_v29  ;;  %v711_v38 = vand.u32 4294901760, %v710_v30  ;;  %419 = vmatpush.msra.mxu0 %v2728_v9  ;;  %v728_v44 = vsub.f32 %v2754_v20, %v727_v32  ;;  %v3817_v45 = vand.u32 4294901760, %v2789_v36  ;;  %v381_v30 = vld [vmem:[%s2700_s1 + $0x88] sm:$0xff] }
  0x54   : > { %v717_v43 = vand.u32 4294901760, %v716_v31  ;;  %v2806_v46 = vsub.f32 %v403_v17, %v2765_v27  ;;  %v3815_v48 = vand.u32 4294901760, %v2795_v40  ;;  %v723_v50 = vand.u32 4294901760, %v722_v34  ;;  %s2083_s27 = smul.u32 96, %s3994_s8 }
  0x55   : > { %2055 = vmatpush.msra.mxu2 %v2730_v10  ;;  %2067 = vmatpush.msra.mxu3 %v705_v37  ;;  %v734_v51 = vsub.f32 %v2768_v28, %v3818_v39  ;;  %v2816_v52 = vand.u32 4294901760, %v400_v42  ;;  %v2819_v53 = vsub.f32 %v402_v25, %v2786_v35  ;;  %v2824_v56 = vand.u32 4294901760, %v380_v47 }
  0x56   : > { %706 = vmatpush.msra.mxu1 %v705_v37  ;;  %421 = vmatpush.msra.mxu0 %v2730_v10  ;;  %v3811_v54 = vand.u32 4294901760, %v2806_v46  ;;  %v729_v57 = vand.u32 4294901760, %v728_v44  ;;  %v740_v58 = vsub.f32 %v2789_v36, %v3817_v45  ;;  %v2830_v59 = vand.u32 4294901760, %v399_v49  ;;  %v383_v45 = vld [vmem:[%s2700_s1 + $0x98] sm:$0xff]  ;;  %s1893_s9 = sadd.s32 %s3996_s10, %s2083_s27  ;;  %s2337_s22 = scalar_lea.hbm %s3999_s5, 1536 }
  0x57   : > { %2056 = vmatpush.msra.mxu2 %v2732_v11  ;;  %2068 = vmatpush.msra.mxu3 %v711_v38  ;;  %v2833_v60 = vsub.f32 %v401_v33, %v2797_v41  ;;  %v746_v61 = vsub.f32 %v2795_v40, %v3815_v48  ;;  %v735_v63 = vand.u32 4294901760, %v734_v51  ;;  %v2841_v0 = vand.u32 4294901760, %v398_v55  ;;  %s2047_s7 = sshll.u32 %s1893_s9, 3 }
  0x58   : > { %712 = vmatpush.msra.mxu1 %v711_v38  ;;  %423 = vmatpush.msra.mxu0 %v2732_v11  ;;  %v3810_v1 = vand.u32 4294901760, %v2819_v53  ;;  %v2846_v6 = vsub.f32 %v400_v42, %v2816_v52  ;;  %v752_v7 = vsub.f32 %v2806_v46, %v3811_v54  ;;  %v2853_v8 = vsub.f32 %v380_v47, %v2824_v56  ;;  %s1895_s18 = scalar_lea.hbm %s3999_s5, %s2047_s7 }
  0x59   : > { %2057 = vmatpush.msra.mxu2 %v2748_v18  ;;  %2069 = vmatpush.msra.mxu3 %v717_v43  ;;  %v741_v13 = vand.u32 4294901760, %v740_v58  ;;  %v2857_v17 = vand.u32 4294901760, %v397_v62  ;;  %v3807_v25 = vand.u32 4294901760, %v2833_v60  ;;  %v2861_v29 = vsub.f32 %v399_v49, %v2830_v59  ;;  %s1898_s11 = sshll.u32 %s1895_s18, 4  ;;  %s1899_s11 = int_to_ptr.hbm [resolvable:$true] %s1898_s11 }
  0x5a   : > { %718 = vmatpush.msra.mxu1 %v717_v43  ;;  %425 = vmatpush.msra.mxu0 %v2748_v18  ;;  %v747_v31 = vand.u32 4294901760, %v746_v61  ;;  %v2864_v33 = vand.u32 4294901760, %v396_v2  ;;  %v758_v34 = vsub.f32 %v2819_v53, %v3810_v1  ;;  %v3809_v37 = vand.u32 4294901760, %v2846_v6 }
  0x5b   : > { %2058 = vmatpush.msra.mxu2 %v2760_v24  ;;  %2070 = vmatpush.msra.mxu3 %v723_v50  ;;  %v2873_v38 = vsub.f32 %v398_v55, %v2841_v0  ;;  %v2875_v42 = vand.u32 4294901760, %v364_v12  ;;  %v753_v43 = vand.u32 4294901760, %v752_v7  ;;  %v3808_v44 = vand.u32 4294901760, %v2853_v8 }
  0x5c   : > { %724 = vmatpush.msra.mxu1 %v723_v50  ;;  %427 = vmatpush.msra.mxu0 %v2760_v24  ;;  %v2879_v47 = vand.u32 4294901760, %v381_v30  ;;  %v764_v49 = vsub.f32 %v2833_v60, %v3807_v25  ;;  %v3812_v50 = vand.u32 4294901760, %v2861_v29  ;;  %v2887_v51 = vsub.f32 %v397_v62, %v2857_v17 }
  0x5d   : > { %2059 = vmatpush.msra.mxu2 %v2765_v27  ;;  %2071 = vmatpush.msra.mxu3 %v729_v57  ;;  %v2890_v55 = vsub.f32 %v364_v12, %v2875_v42  ;;  %v759_v58 = vand.u32 4294901760, %v758_v34  ;;  %v770_v61 = vsub.f32 %v2846_v6, %v3809_v37  ;;  %v2900_v62 = vsub.f32 %v396_v2, %v2864_v33  ;;  %v382_v34 = vld [vmem:[%s2700_s1 + $0x90] sm:$0xff] }
  0x5e   : > { %730 = vmatpush.msra.mxu1 %v729_v57  ;;  %429 = vmatpush.msra.mxu0 %v2765_v27  ;;  %v365_v57 = vld [vmem:[%s2700_s1 + $0x8] sm:$0xff]  ;;  %v575_v7 = vsub.f32 %v2853_v8, %v3808_v44  ;;  %v2907_v12 = vsub.f32 %v381_v30, %v2879_v47  ;;  %v765_v2 = vand.u32 4294901760, %v764_v49  ;;  %v3816_v44 = vand.u32 4294901760, %v2887_v51 }
  0x5f   : > { %2060 = vmatpush.msra.mxu2 %v2786_v35  ;;  %2072 = vmatpush.msra.mxu3 %v735_v63  ;;  %v2911_v25 = vand.u32 4294901760, %v365_v57  ;;  %v771_v30 = vand.u32 4294901760, %v770_v61  ;;  %v793_v49 = vand.u32 4294901760, %v2900_v62  ;;  %v2924_v1 = vand.u32 4294901760, %v382_v34 }
  0x60   : > { %736 = vmatpush.msra.mxu1 %v735_v63  ;;  %431 = vmatpush.msra.mxu0 %v2786_v35  ;;  %v3813_v63 = vand.u32 4294901760, %v2873_v38  ;;  %v576_v54 = vand.u32 4294901760, %v575_v7  ;;  %v366_v7 = vld [vmem:[%s2700_s1 + $0x10] sm:$0xff] }
  0x61   : > { %2061 = vmatpush.msra.mxu2 %v2797_v41  ;;  %2073 = vmatpush.msra.mxu3 %v741_v13  ;;  %v2932_v61 = vsub.f32 %v365_v57, %v2911_v25  ;;  %v794_v57 = vsub.f32 %v2900_v62, %v793_v49  ;;  %v2945_v48 = vsub.f32 %v382_v34, %v2924_v1  ;;  %v2952_v39 = vand.u32 4294901760, %v366_v7 }
  0x62   : > { %742 = vmatpush.msra.mxu1 %v741_v13  ;;  %433 = vmatpush.msra.mxu0 %v2797_v41  ;;  %v3814_v13 = vand.u32 4294901760, %v2890_v55  ;;  %v782_v37 = vsub.f32 %v2873_v38, %v3813_v63  ;;  %v2957_v34 = vand.u32 4294901760, %v383_v45 }
  0x63   : > { %2062 = vmatpush.msra.mxu2 %v2816_v52  ;;  %2074 = vmatpush.msra.mxu3 %v747_v31 }
  0x64   : > { %748 = vmatpush.msra.mxu1 %v747_v31  ;;  %435 = vmatpush.msra.mxu0 %v2816_v52  ;;  %v776_v31 = vsub.f32 %v2861_v29, %v3812_v50  ;;  %v3827_v50 = vand.u32 4294901760, %v2907_v12 }
  0x65   : > { %2063 = vmatpush.msra.mxu2 %v2830_v59  ;;  %2075 = vmatpush.msra.mxu3 %v753_v43 }
  0x66   : > { %754 = vmatpush.msra.mxu1 %v753_v43  ;;  %437 = vmatpush.msra.mxu0 %v2830_v59  ;;  %v447_v43 = vsub.f32 %v2890_v55, %v3814_v13  ;;  %v777_v63 = vand.u32 4294901760, %v776_v31  ;;  %v783_v13 = vand.u32 4294901760, %v782_v37  ;;  %v583_v31 = vsub.f32 %v2907_v12, %v3827_v50 }
  0x67   : > { %2064 = vmatpush.msra.mxu2 %v2841_v0  ;;  %2076 = vmatpush.msra.mxu3 %v759_v58 }
  0x68   : > { %760 = vmatpush.msra.mxu1 %v759_v58  ;;  %439 = vmatpush.msra.mxu0 %v2841_v0  ;;  %v788_v58 = vsub.f32 %v2887_v51, %v3816_v44  ;;  %v3840_v44 = vand.u32 4294901760, %v2932_v61 }
  0x69   : > { %2065 = vmatpush.msra.mxu2 %v2857_v17  ;;  %2077 = vmatpush.msra.mxu3 %v765_v2 }
  0x6a   : > { %766 = vmatpush.msra.mxu1 %v765_v2  ;;  %441 = vmatpush.msra.mxu0 %v2857_v17  ;;  %v448_v2 = vand.u32 4294901760, %v447_v43  ;;  %v789_v37 = vand.u32 4294901760, %v788_v58  ;;  %v3826_v43 = vand.u32 4294901760, %v2945_v48  ;;  %v455_v58 = vsub.f32 %v2932_v61, %v3840_v44  ;;  %v394_v44 = vld [vmem:[%s2700_s1 + $0xf0] sm:$0xff] }
  0x6b   : > { %2066 = vmatpush.msra.mxu2 %v2864_v33  ;;  %2078 = vmatpush.msra.mxu3 %v771_v30 }
  0x6c   : > { %577 = vmatmul.f32.vlgmr.msra.gmra.mxu2 %v576_v54  ;;  %772 = vmatpush.msra.mxu1 %v771_v30  ;;  %v795_v54 = vand.u32 4294901760, %v794_v57  ;;  %v584_v30 = vand.u32 4294901760, %v583_v31  ;;  %v367_v57 = vld [vmem:[%s2700_s1 + $0x18] sm:$0xff]  ;;  %v384_v31 = vld [vmem:[%s2700_s1 + $0xa0] sm:$0xff] }
  0x6d   : > { %2079 = vmatpush.msra.mxu3 %v777_v63  ;;  %928 = vmatpush.msrb.mxu2 %v2738_v14  ;;  %v456_v14 = vand.u32 4294901760, %v455_v58 }
  0x6e   : > { %778 = vmatpush.msra.mxu1 %v777_v63  ;;  %443 = vmatpush.msra.mxu0 %v2864_v33  ;;  %v2964_v63 = vsub.f32 %v366_v7, %v2952_v39  ;;  %v591_v7 = vsub.f32 %v2945_v48, %v3826_v43 }
  0x6f   : > { %2080 = vmatpush.msra.mxu3 %v783_v13  ;;  %931 = vmatpush.msrb.mxu2 %v2741_v15  ;;  %v2988_v15 = vand.u32 4294901760, %v384_v31 }
  0x70   : > { %784 = vmatpush.msra.mxu1 %v783_v13  ;;  %449 = vmatmul.f32.vlgmr.msra.gmra.mxu0 %v448_v2  ;;  %v2971_v13 = vsub.f32 %v383_v45, %v2957_v34  ;;  %v2981_v2 = vand.u32 4294901760, %v367_v57 }
  0x71   : > { %2081 = vmatpush.msra.mxu3 %v789_v37  ;;  %1363 = vmatpush.msrb.mxu0 %v703_v21  ;;  %v3838_v21 = vand.u32 4294901760, %v2964_v63 }
  0x72   : > { %790 = vmatpush.msra.mxu1 %v789_v37  ;;  %934 = vmatpush.msrb.mxu2 %v2744_v16  ;;  %v3824_v45 = vand.u32 4294901760, %v2971_v13 }
  0x73   : > { %2082 = vmatpush.msra.mxu3 %v795_v54  ;;  %1367 = vmatpush.msrb.mxu0 %v709_v22  ;;  %v592_v22 = vand.u32 4294901760, %v591_v7  ;;  %v463_v37 = vsub.f32 %v2964_v63, %v3838_v21 }
  0x74   : > { %585 = vmatmul.f32.gmra.mxu2 %v584_v30  ;;  %862 = vmatmul.f32.vlgmr.msra.gmra.mxu3 %v2824_v56  ;;  %v3005_v30 = vsub.f32 %v384_v31, %v2988_v15 }
  0x75   : > { %1136 = vmatpush.msrb.mxu3 %v2719_v3  ;;  %796 = vmatpush.msra.mxu1 %v795_v54  ;;  %v2996_v54 = vsub.f32 %v367_v57, %v2981_v2  ;;  %v464_v58 = vand.u32 4294901760, %v463_v37  ;;  %v385_v57 = vld [vmem:[%s2700_s1 + $0xa8] sm:$0xff]  ;;  %v386_v37 = vld [vmem:[%s2700_s1 + $0xb0] sm:$0xff] }
  0x76   : > { %798 = vmatmul.f32.vlgmr.msra.gmra.mxu1 %v2875_v42  ;;  %937 = vmatpush.msrb.mxu2 %v2751_v19  ;;  %v3028_v31 = vand.u32 4294901760, %v385_v57 }
  0x77   : > { %1138 = vmatpush.msrb.mxu3 %v2721_v4  ;;  %1554 = vmatpush.msrb.mxu1 %v2719_v3  ;;  %v368_v3 = vld [vmem:[%s2700_s1 + $0x20] sm:$0xff]  ;;  %v3836_v16 = vand.u32 4294901760, %v2996_v54 }
  0x78   : > { %457 = vmatmul.f32.gmra.mxu0 %v456_v14  ;;  %940 = vmatpush.msrb.mxu2 %v2754_v20 }
  0x79   : > { %1140 = vmatpush.msrb.mxu3 %v2723_v5  ;;  %1556 = vmatpush.msrb.mxu1 %v2721_v4  ;;  %v599_v4 = vsub.f32 %v2971_v13, %v3824_v45  ;;  %v471_v14 = vsub.f32 %v2996_v54, %v3836_v16 }
  0x7a   : > { %1371 = vmatpush.msrb.mxu0 %v715_v23  ;;  %943 = vmatpush.msrb.mxu2 %v2768_v28  ;;  %v3014_v23 = vand.u32 4294901760, %v368_v3 }
  0x7b   : > { %1142 = vmatpush.msrb.mxu3 %v2728_v9  ;;  %1558 = vmatpush.msrb.mxu1 %v2723_v5  ;;  %v3823_v5 = vand.u32 4294901760, %v3005_v30  ;;  %v600_v7 = vand.u32 4294901760, %v599_v4  ;;  %v472_v20 = vand.u32 4294901760, %v471_v14  ;;  %v3901_v14 = vand.u32 4294901760, %v2795_v40 }
  0x7c   : > { %593 = vmatmul.f32.gmra.mxu2 %v592_v22  ;;  %866 = vmatmul.f32.gmra.mxu3 %v2879_v47  ;;  %v3031_v19 = vsub.f32 %v368_v3, %v3014_v23  ;;  %v3899_v22 = vand.u32 4294901760, %v2768_v28  ;;  %v3900_v28 = vand.u32 4294901760, %v2789_v36 }
  0x7d   : > { %1144 = vmatpush.msrb.mxu3 %v2730_v10  ;;  %1375 = vmatpush.msrb.mxu0 %v721_v26  ;;  %v607_v26 = vsub.f32 %v3005_v30, %v3823_v5 }
  0x7e   : > { %802 = vmatmul.f32.gmra.mxu1 %v2911_v25  ;;  %946 = vmatpush.msrb.mxu2 %v2789_v36 }
  0x7f   : > { %1560 = vmatpush.msrb.mxu1 %v2728_v9  ;;  %1146 = vmatpush.msrb.mxu3 %v2732_v11  ;;  %v369_v9 = vld [vmem:[%s2700_s1 + $0x28] sm:$0xff]  ;;  %v608_v4 = vand.u32 4294901760, %v607_v26  ;;  %v3902_v26 = vand.u32 4294901760, %v2806_v46 }
  0x80   : > { %465 = vmatmul.f32.gmra.mxu0 %v464_v58  ;;  %949 = vmatpush.msrb.mxu2 %v2795_v40  ;;  %v3052_v3 = vand.u32 4294901760, %v369_v9 }
  0x81   : > { %1379 = vmatpush.msrb.mxu0 %v727_v32  ;;  %1562 = vmatpush.msrb.mxu1 %v2730_v10  ;;  %v3048_v10 = vsub.f32 %v385_v57, %v3028_v31  ;;  %v3834_v32 = vand.u32 4294901760, %v3031_v19 }
  0x82   : > { %1148 = vmatpush.msrb.mxu3 %v2748_v18  ;;  %952 = vmatpush.msrb.mxu2 %v2806_v46  ;;  %v3068_v36 = vsub.f32 %v369_v9, %v3052_v3  ;;  %v3903_v46 = vand.u32 4294901760, %v2819_v53 }
  0x83   : > { %1383 = vmatpush.msrb.mxu0 %v3899_v22  ;;  %1564 = vmatpush.msrb.mxu1 %v2732_v11  ;;  %v3059_v11 = vand.u32 4294901760, %v386_v37  ;;  %v3822_v58 = vand.u32 4294901760, %v3048_v10  ;;  %v479_v57 = vsub.f32 %v3031_v19, %v3834_v32 }
  0x84   : > { %601 = vmatmul.f32.gmra.mxu2 %v600_v7  ;;  %870 = vmatmul.f32.gmra.mxu3 %v2924_v1  ;;  %v370_v7 = vld [vmem:[%s2700_s1 + $0x30] sm:$0xff]  ;;  %v3833_v9 = vand.u32 4294901760, %v3068_v36 }
  0x85   : > { %1150 = vmatpush.msrb.mxu3 %v2760_v24  ;;  %1387 = vmatpush.msrb.mxu0 %v3900_v28  ;;  %v615_v40 = vsub.f32 %v3048_v10, %v3822_v58  ;;  %v3088_v22 = vand.u32 4294901760, %v370_v7 }
  0x86   : > { %806 = vmatmul.f32.gmra.mxu1 %v2952_v39  ;;  %955 = vmatpush.msrb.mxu2 %v2819_v53  ;;  %v487_v28 = vsub.f32 %v3068_v36, %v3833_v9 }
  0x87   : > { %1566 = vmatpush.msrb.mxu1 %v2748_v18  ;;  %1152 = vmatpush.msrb.mxu3 %v2765_v27  ;;  %v3078_v18 = vsub.f32 %v386_v37, %v3059_v11  ;;  %v616_v37 = vand.u32 4294901760, %v615_v40  ;;  %v3105_v53 = vsub.f32 %v370_v7, %v3088_v22  ;;  %v388_v40 = vld [vmem:[%s2700_s1 + $0xc0] sm:$0xff] }
  0x88   : > { %473 = vmatmul.f32.gmra.mxu0 %v472_v20  ;;  %958 = vmatpush.msrb.mxu2 %v2833_v60  ;;  %v387_v20 = vld [vmem:[%s2700_s1 + $0xb8] sm:$0xff] }
  0x89   : > { %1391 = vmatpush.msrb.mxu0 %v3901_v14  ;;  %1568 = vmatpush.msrb.mxu1 %v2760_v24  ;;  %v480_v24 = vand.u32 4294901760, %v479_v57  ;;  %v371_v57 = vld [vmem:[%s2700_s1 + $0x38] sm:$0xff]  ;;  %v3904_v14 = vand.u32 4294901760, %v2833_v60  ;;  %v488_v60 = vand.u32 4294901760, %v487_v28  ;;  %v372_v28 = vld [vmem:[%s2700_s1 + $0x40] sm:$0xff] }
  0x8a   : > { %1154 = vmatpush.msrb.mxu3 %v2786_v35  ;;  %961 = vmatpush.msrb.mxu2 %v2846_v6 }
  0x8b   : > { %1395 = vmatpush.msrb.mxu0 %v3902_v26  ;;  %1570 = vmatpush.msrb.mxu1 %v2765_v27  ;;  %v3821_v27 = vand.u32 4294901760, %v3078_v18  ;;  %v3905_v26 = vand.u32 4294901760, %v2846_v6  ;;  %v3906_v6 = vand.u32 4294901760, %v2861_v29 }
  0x8c   : > { %609 = vmatmul.f32.gmra.mxu2 %v608_v4  ;;  %874 = vmatmul.f32.gmra.mxu3 %v2957_v34  ;;  %v3102_v4 = vand.u32 4294901760, %v387_v20 }
  0x8d   : > { %1156 = vmatpush.msrb.mxu3 %v2797_v41  ;;  %1399 = vmatpush.msrb.mxu0 %v3903_v46 }
  0x8e   : > { %810 = vmatmul.f32.gmra.mxu1 %v2981_v2  ;;  %964 = vmatpush.msrb.mxu2 %v2861_v29  ;;  %v3122_v7 = vsub.f32 %v387_v20, %v3102_v4 }
  0x8f   : > { %1572 = vmatpush.msrb.mxu1 %v2786_v35  ;;  %1158 = vmatpush.msrb.mxu3 %v2816_v52  ;;  %v623_v35 = vsub.f32 %v3078_v18, %v3821_v27 }
  0x90   : > { %481 = vmatmul.f32.gmra.mxu0 %v480_v24  ;;  %967 = vmatpush.msrb.mxu2 %v2873_v38  ;;  %v3126_v24 = vand.u32 4294901760, %v371_v57  ;;  %v3820_v46 = vand.u32 4294901760, %v3122_v7 }
  0x91   : > { %1403 = vmatpush.msrb.mxu0 %v3904_v14  ;;  %1574 = vmatpush.msrb.mxu1 %v2797_v41  ;;  %v3832_v41 = vand.u32 4294901760, %v3105_v53  ;;  %v624_v20 = vand.u32 4294901760, %v623_v35  ;;  %v3908_v14 = vand.u32 4294901760, %v2873_v38  ;;  %v3909_v35 = vand.u32 4294901760, %v2887_v51 }
  0x92   : > { %1160 = vmatpush.msrb.mxu3 %v2830_v59  ;;  %970 = vmatpush.msrb.mxu2 %v2887_v51  ;;  %v631_v38 = vsub.f32 %v3122_v7, %v3820_v46 }
  0x93   : > { %1407 = vmatpush.msrb.mxu0 %v3905_v26  ;;  %1576 = vmatpush.msrb.mxu1 %v2816_v52  ;;  %v3133_v52 = vand.u32 4294901760, %v388_v40  ;;  %v495_v29 = vsub.f32 %v3105_v53, %v3832_v41  ;;  %v3160_v26 = vand.u32 4294901760, %v372_v28 }
  0x94   : > { %617 = vmatmul.f32.gmra.mxu2 %v616_v37  ;;  %878 = vmatmul.f32.gmra.mxu3 %v2988_v15  ;;  %v3142_v37 = vsub.f32 %v371_v57, %v3126_v24  ;;  %v632_v51 = vand.u32 4294901760, %v631_v38 }
  0x95   : > { %1162 = vmatpush.msrb.mxu3 %v2841_v0  ;;  %1411 = vmatpush.msrb.mxu0 %v3906_v6  ;;  %3907 = vst [vmem:[#allocation26_spill] sm:$0xff] %v3133_v52  ;;  %v496_v57 = vand.u32 4294901760, %v495_v29 }
  0x96   : > { %814 = vmatmul.f32.gmra.mxu1 %v3014_v23  ;;  %973 = vmatpush.msrb.mxu2 %v2900_v62  ;;  %v373_v62 = vld [vmem:[%s2700_s1 + $0x48] sm:$0xff] }
  0x97   : > { %1578 = vmatpush.msrb.mxu1 %v2830_v59  ;;  %1164 = vmatpush.msrb.mxu3 %v2857_v17  ;;  %v3150_v59 = vsub.f32 %v388_v40, %v3133_v52  ;;  %v3186_v38 = vand.u32 4294901760, %v373_v62 }
  0x98   : > { %489 = vmatmul.f32.gmra.mxu0 %v488_v60  ;;  %v389_v60 = vld [vmem:[%s2700_s1 + $0xc8] sm:$0xff] }
  0x99   : > { %1415 = vmatpush.msrb.mxu0 %v3908_v14  ;;  %1580 = vmatpush.msrb.mxu1 %v2841_v0  ;;  %v3830_v0 = vand.u32 4294901760, %v3142_v37  ;;  %v3171_v6 = vand.u32 4294901760, %v389_v60 }
  0x9a   : > { %1166 = vmatpush.msrb.mxu3 %v2864_v33 }
  0x9b   : > { %1419 = vmatpush.msrb.mxu0 %v3909_v35  ;;  %1582 = vmatpush.msrb.mxu1 %v2857_v17  ;;  %v3819_v17 = vand.u32 4294901760, %v3150_v59  ;;  %v503_v40 = vsub.f32 %v3142_v37, %v3830_v0  ;;  %3910 = vst [vmem:[#allocation27_spill] sm:$0xff] %v3171_v6  ;;  %v3182_v29 = vsub.f32 %v389_v60, %v3171_v6  ;;  %v390_v35 = vld [vmem:[%s2700_s1 + $0xd0] sm:$0xff] }
  0x9c   : > { %625 = vmatmul.f32.gmra.mxu2 %v624_v20  ;;  %882 = vmatmul.f32.gmra.mxu3 %v3028_v31  ;;  %v3174_v20 = vsub.f32 %v372_v28, %v3160_v26  ;;  %v3189_v28 = vand.u32 4294901760, %v390_v35  ;;  %v3196_v60 = vsub.f32 %v373_v62, %v3186_v38  ;;  %v391_v62 = vld [vmem:[%s2700_s1 + $0xd8] sm:$0xff] }
  0x9d   : > { %1423 = vmatpush.msrb.mxu0 %v793_v49  ;;  %1584 = vmatpush.msrb.mxu1 %v2864_v33  ;;  %v639_v33 = vsub.f32 %v3150_v59, %v3819_v17  ;;  %v504_v49 = vand.u32 4294901760, %v503_v40  ;;  %3911 = vst [vmem:[#allocation28_spill] sm:$0xff] %v3182_v29  ;;  %v374_v17 = vld [vmem:[%s2700_s1 + $0x50] sm:$0xff]  ;;  %v3215_v45 = vand.u32 4294901760, %v391_v62 }
  0x9e   : > { %818 = vmatmul.f32.gmra.mxu1 %v3052_v3  ;;  %v3829_v14 = vand.u32 4294901760, %v3174_v20  ;;  %3912 = vst [vmem:[#allocation29_spill] sm:$0xff] %v3189_v28  ;;  %v3200_v46 = vsub.f32 %v390_v35, %v3189_v28  ;;  %v3828_v27 = vand.u32 4294901760, %v3196_v60  ;;  %v3207_v58 = vand.u32 4294901760, %v374_v17 }
  0x9f   : > { %3914 = vst [vmem:[#allocation31_spill] sm:$0xff] %v3215_v45 }
  0xa0   : > { %497 = vmatmul.f32.gmra.mxu0 %v496_v57  ;;  %v640_v57 = vand.u32 4294901760, %v639_v33  ;;  %v511_v40 = vsub.f32 %v3174_v20, %v3829_v14  ;;  %3913 = vst [vmem:[#allocation30_spill] sm:$0xff] %v3200_v46  ;;  %v3831_v5 = vand.u32 4294901760, %v3200_v46 }
  0xa2   : > { %v655_v43 = vsub.f32 %v3200_v46, %v3831_v5  ;;  %v376_v5 = vld [vmem:[%s2700_s1 + $0x60] sm:$0xff] }
  0xa3   : > { %v3251_v32 = vand.u32 4294901760, %v376_v5 }
  0xa4   : > { %633 = vmatmul.f32.gmra.mxu2 %v632_v51  ;;  %886 = vmatmul.f32.gmra.mxu3 %v3059_v11  ;;  %v3825_v51 = vand.u32 4294901760, %v3182_v29  ;;  %v656_v0 = vand.u32 4294901760, %v655_v43 }
  0xa6   : > { %822 = vmatmul.f32.gmra.mxu1 %v3088_v22  ;;  %v647_v33 = vsub.f32 %v3182_v29, %v3825_v51  ;;  %v375_v51 = vld [vmem:[%s2700_s1 + $0x58] sm:$0xff] }
  0xa7   : > { %v3230_v14 = vand.u32 4294901760, %v375_v51 }
  0xa8   : > { %505 = vmatmul.f32.gmra.mxu0 %v504_v49  ;;  %v512_v49 = vand.u32 4294901760, %v511_v40  ;;  %v648_v35 = vand.u32 4294901760, %v647_v33  ;;  %v3218_v40 = vsub.f32 %v374_v17, %v3207_v58 }
  0xaa   : > { %v3835_v50 = vand.u32 4294901760, %v3218_v40 }
  0xac   : > { %641 = vmatmul.f32.gmra.mxu2 %v640_v57  ;;  %890 = vmatmul.f32.gmra.mxu3 %v3102_v4  ;;  %v519_v57 = vsub.f32 %v3196_v60, %v3828_v27  ;;  %v392_v27 = vld [vmem:[%s2700_s1 + $0xe0] sm:$0xff] }
  0xad   : > { %v3233_v17 = vand.u32 4294901760, %v392_v27 }
  0xae   : > { %826 = vmatmul.f32.gmra.mxu1 %v3126_v24  ;;  %v520_v33 = vand.u32 4294901760, %v519_v57  ;;  %v527_v57 = vsub.f32 %v3218_v40, %v3835_v50 }
  0xaf   : > { %v3244_v41 = vsub.f32 %v392_v27, %v3233_v17 }
  0xb0   : > { %513 = vmatmul.f32.gmra.mxu0 %v512_v49  ;;  %v3226_v49 = vsub.f32 %v391_v62, %v3215_v45  ;;  %v3240_v62 = vsub.f32 %v375_v51, %v3230_v14  ;;  %v393_v51 = vld [vmem:[%s2700_s1 + $0xe8] sm:$0xff] }
  0xb1   : > { %3916 = vst [vmem:[#allocation33_spill] sm:$0xff] %v3244_v41  ;;  %v3845_v50 = vand.u32 4294901760, %v3244_v41  ;;  %v3259_v16 = vand.u32 4294901760, %v393_v51 }
  0xb2   : > { %3915 = vst [vmem:[#allocation32_spill] sm:$0xff] %v3226_v49  ;;  %v3839_v9 = vand.u32 4294901760, %v3240_v62 }
  0xb3   : > { %v671_v21 = vsub.f32 %v3244_v41, %v3845_v50  ;;  %v378_v50 = vld [vmem:[%s2700_s1 + $0x70] sm:$0xff] }
  0xb4   : > { %649 = vmatmul.f32.gmra.mxu2 %v648_v35  ;;  %894 = vmatmul.f32.gmra.mxu3 %v3133_v52  ;;  %v3837_v35 = vand.u32 4294901760, %v3226_v49 }
  0xb5   : > { %v672_v46 = vand.u32 4294901760, %v671_v21 }
  0xb6   : > { %830 = vmatmul.f32.gmra.mxu1 %v3160_v26  ;;  %v663_v43 = vsub.f32 %v3226_v49, %v3837_v35  ;;  %v377_v35 = vld [vmem:[%s2700_s1 + $0x68] sm:$0xff] }
  0xb7   : > { %v3274_v49 = vand.u32 4294901760, %v377_v35 }
  0xb8   : > { %521 = vmatmul.f32.gmra.mxu0 %v520_v33  ;;  %v528_v33 = vand.u32 4294901760, %v527_v57  ;;  %v664_v27 = vand.u32 4294901760, %v663_v43  ;;  %v3262_v57 = vsub.f32 %v376_v5, %v3251_v32  ;;  %v3277_v5 = vand.u32 4294901760, %v394_v44 }
  0xba   : > { %v3288_v41 = vsub.f32 %v394_v44, %v3277_v5 }
  0xbc   : > { %657 = vmatmul.f32.gmra.mxu2 %v656_v0  ;;  %898 = vmatmul.f32.gmra.mxu3 %v3171_v6  ;;  %v535_v0 = vsub.f32 %v3240_v62, %v3839_v9  ;;  %v3852_v9 = vand.u32 4294901760, %v3262_v57  ;;  %v3295_v6 = vand.u32 4294901760, %v378_v50 }
  0xbe   : > { %834 = vmatmul.f32.gmra.mxu1 %v3186_v38  ;;  %v536_v43 = vand.u32 4294901760, %v535_v0  ;;  %v543_v0 = vsub.f32 %v3262_v57, %v3852_v9  ;;  %v395_v9 = vld [vmem:[%s2700_s1 + $0xf8] sm:$0xff] }
  0xc0   : > { %529 = vmatmul.f32.gmra.mxu0 %v528_v33  ;;  %v3270_v33 = vsub.f32 %v393_v51, %v3259_v16  ;;  %v3284_v51 = vsub.f32 %v377_v35, %v3274_v49  ;;  %v3863_v35 = vand.u32 4294901760, %v3288_v41 }
  0xc2   : > { %3917 = vst [vmem:[#allocation34_spill] sm:$0xff] %v3270_v33 }
  0xc4   : > { %665 = vmatmul.f32.gmra.mxu2 %v664_v27  ;;  %902 = vmatmul.f32.gmra.mxu3 %v3189_v28  ;;  %v3855_v27 = vand.u32 4294901760, %v3270_v33  ;;  %v3860_v28 = vand.u32 4294901760, %v3284_v51 }
  0xc6   : > { %838 = vmatmul.f32.gmra.mxu1 %v3207_v58  ;;  %v679_v21 = vsub.f32 %v3270_v33, %v3855_v27  ;;  %v551_v44 = vsub.f32 %v3284_v51, %v3860_v28  ;;  %v3306_v27 = vsub.f32 %v378_v50, %v3295_v6  ;;  %v687_v33 = vsub.f32 %v3288_v41, %v3863_v35 }
  0xc8   : > { %537 = vmatmul.f32.gmra.mxu0 %v536_v43  ;;  %v544_v43 = vand.u32 4294901760, %v543_v0  ;;  %v680_v29 = vand.u32 4294901760, %v679_v21  ;;  %v379_v0 = vld [vmem:[%s2700_s1 + $0x78] sm:$0xff]  ;;  %v688_v50 = vand.u32 4294901760, %v687_v33  ;;  %s2331_s1 = sshra.s32 %s1899_s11, 4  ;;  %s2332_s1 = int_to_ptr.hbm [resolvable:$true] %s2331_s1 }
  0xc9   : > { %v3317_v28 = vand.u32 4294901760, %v379_v0  ;;  %s2333_s3 = scalar_lea.hbm %s2332_s1, 256  ;;  %p2338_p2 = scmp.lt.s32.totalorder %s2332_s1, %s3999_s5 }
  0xca   : > { %p2334_p4 = scmp.ne.s32.totalorder %s2332_s1, %s2333_s3  ;;  %p2339_p1 = scmp.lt.s32.totalorder %s2337_s22, %s2333_s3 }
  0xcb   : > { %v3325_v35 = vsub.f32 %v379_v0, %v3317_v28 }
  0xcc   : > { %673 = vmatmul.f32.gmra.mxu2 %v672_v46  ;;  %906 = vmatmul.f32.gmra.mxu3 %v3215_v45  ;;  %v3303_v46 = vand.u32 4294901760, %v395_v9  ;;  %v552_v45 = vand.u32 4294901760, %v551_v44  ;;  %p2335_p6 = pnand %p2334_p4, %p2666_p3  ;;  %p2340_p7 = por %p2339_p1, %p2338_p2 }
  0xcd   : > { %v3866_v33 = vand.u32 4294901760, %v3325_v35 }
  0xce   : > { %842 = vmatmul.f32.gmra.mxu1 %v3230_v14  ;;  %3918 = vst [vmem:[#allocation35_spill] sm:$0xff] %v3303_v46  ;;  %v3314_v21 = vsub.f32 %v395_v9, %v3303_v46  ;;  %p2336_p9 = pneg %p2335_p6 }
  0xd0   : > { %545 = vmatmul.f32.gmra.mxu0 %v544_v43  ;;  %3919 = vst [vmem:[#allocation36_spill] sm:$0xff] %v3314_v21  ;;  %v3864_v43 = vand.u32 4294901760, %v3306_v27  ;;  %v3865_v52 = vand.u32 4294901760, %v3314_v21  ;;  %p2341_p8 = pnand %p2340_p7, %p2336_p9 }
  0xd2   : > { %v695_v9 = vsub.f32 %v3314_v21, %v3865_v52 }
  0xd4   : > { %681 = vmatmul.f32.gmra.mxu2 %v680_v29  ;;  %910 = vmatmul.f32.gmra.mxu3 %v3233_v17  ;;  %v559_v29 = vsub.f32 %v3306_v27, %v3864_v43  ;;  %v567_v43 = vsub.f32 %v3325_v35, %v3866_v33 }
  0xd6   : > { %846 = vmatmul.f32.gmra.mxu1 %v3251_v32  ;;  %v560_v44 = vand.u32 4294901760, %v559_v29  ;;  %v568_v0 = vand.u32 4294901760, %v567_v43  ;;  %v3920_v43 = vand.u32 4294901760, %v2890_v55 }
  0xd8   : > { %553 = vmatmul.f32.gmra.mxu0 %v552_v45  ;;  %v696_v45 = vand.u32 4294901760, %v695_v9 }
  0xdc   : > { %689 = vmatmul.f32.gmra.mxu2 %v688_v50  ;;  %914 = vmatmul.f32.gmra.mxu3 %v3259_v16 }
  0xde   : > { %850 = vmatmul.f32.gmra.mxu1 %v3274_v49 }
  0xe0   : > { %561 = vmatmul.f32.gmra.mxu0 %v560_v44 }
  0xe4   : > { %697 = vmatmul.f32.gmra.mxu2 %v696_v45  ;;  %918 = vmatmul.f32.gmra.mxu3 %v3277_v5 }
  0xe6   : > { %854 = vmatmul.f32.gmra.mxu1 %v3295_v6 }
  0xe8   : > { %569 = vmatmul.f32.gmra.mxu0 %v568_v0 }
  0xec   : > { %922 = vmatmul.f32.gmra.mxu3 %v3303_v46  ;;  %976 = vmatmul.f32.vlgmr.msrb.gmra.mxu2 %v2890_v55  ;;  %v3922_v55 = vand.u32 4294901760, %v2932_v61 }
  0xed   : > { %v3340_v50 = vpop.f32.mrf.mxu0 }
  0xee   : > { %858 = vmatmul.f32.gmra.mxu1 %v3317_v28 }
  0xef   : > { %v578_v29 = vpop.f32.mrf.mxu2 }
  0xf0   : > { %1425 = vmatmul.f32.vlgmr.msrb.gmra.mxu0 %v2875_v42 }
  0xf3   : > { %v3344_v9 = vpop.f32.mrf.mxu1 }
  0xf4   : > { %981 = vmatmul.f32.gmra.mxu2 %v2932_v61  ;;  %1170 = vmatmul.f32.vlgmr.msrb.gmra.mxu3 %v3920_v43 }
  0xf5   : > { %v3349_v44 = vpop.f32.mrf.mxu0 }
  0xf6   : > { %1586 = vmatmul.f32.vlgmr.msrb.gmra.mxu1 %v2875_v42 }
  0xf7   : > { %v586_v45 = vpop.f32.mrf.mxu2  ;;  %v863_v0 = vpop.f32.mrf.mxu3 }
  0xf8   : > { %v3352_v52 = vadd.f32 %v863_v0, %v578_v29  ;;  %1429 = vmatmul.f32.gmra.mxu0 %v2911_v25 }
  0xfa   : > { %3921 = vst [vmem:[#allocation37_spill] sm:$0xff] %v3352_v52  ;;  %v3924_v52 = vand.u32 4294901760, %v2964_v63 }
  0xfb   : > { %v3355_v33 = vpop.f32.mrf.mxu1 }
  0xfc   : > { %986 = vmatmul.f32.gmra.mxu2 %v2964_v63  ;;  %1176 = vmatmul.f32.gmra.mxu3 %v3922_v55 }
  0xfd   : > { %v3364_v43 = vpop.f32.mrf.mxu0 }
  0xfe   : > { %1590 = vmatmul.f32.gmra.mxu1 %v2911_v25 }
  0xff   : > { %v594_v42 = vpop.f32.mrf.mxu2  ;;  %v867_v46 = vpop.f32.mrf.mxu3 }
 0x100   : > { %v3367_v29 = vadd.f32 %v867_v46, %v586_v45  ;;  %1433 = vmatmul.f32.gmra.mxu0 %v2952_v39  ;;  %v3926_v45 = vand.u32 4294901760, %v2996_v54 }
 0x102   : > { %3923 = vst [vmem:[#allocation38_spill] sm:$0xff] %v3367_v29 }
 0x103   : > { %v3370_v0 = vpop.f32.mrf.mxu1 }
 0x104   : > { %991 = vmatmul.f32.gmra.mxu2 %v2996_v54  ;;  %1182 = vmatmul.f32.gmra.mxu3 %v3924_v52 }
 0x105   : > { %v3375_v21 = vpop.f32.mrf.mxu0 }
 0x106   : > { %1594 = vmatmul.f32.gmra.mxu1 %v2952_v39 }
 0x107   : > { %v602_v61 = vpop.f32.mrf.mxu2  ;;  %v871_v55 = vpop.f32.mrf.mxu3 }
 0x108   : > { %v3378_v25 = vadd.f32 %v871_v55, %v594_v42  ;;  %1437 = vmatmul.f32.gmra.mxu0 %v2981_v2  ;;  %v3928_v55 = vand.u32 4294901760, %v3031_v19 }
 0x10a   : > { %3925 = vst [vmem:[#allocation39_spill] sm:$0xff] %v3378_v25 }
 0x10b   : > { %v3381_v46 = vpop.f32.mrf.mxu1 }
 0x10c   : > { %996 = vmatmul.f32.gmra.mxu2 %v3031_v19  ;;  %1188 = vmatmul.f32.gmra.mxu3 %v3926_v45 }
 0x10d   : > { %v3386_v29 = vpop.f32.mrf.mxu0 }
 0x10e   : > { %1598 = vmatmul.f32.gmra.mxu1 %v2981_v2 }
 0x10f   : > { %v610_v63 = vpop.f32.mrf.mxu2  ;;  %v875_v52 = vpop.f32.mrf.mxu3 }
 0x110   : > { %v3389_v39 = vadd.f32 %v875_v52, %v602_v61  ;;  %1441 = vmatmul.f32.gmra.mxu0 %v3014_v23  ;;  %v3930_v52 = vand.u32 4294901760, %v3068_v36 }
 0x112   : > { %3927 = vst [vmem:[#allocation40_spill] sm:$0xff] %v3389_v39 }
 0x113   : > { %v3392_v42 = vpop.f32.mrf.mxu1 }
 0x114   : > { %1001 = vmatmul.f32.gmra.mxu2 %v3068_v36  ;;  %1194 = vmatmul.f32.gmra.mxu3 %v3928_v55 }
 0x115   : > { %v3397_v25 = vpop.f32.mrf.mxu0 }
 0x116   : > { %1602 = vmatmul.f32.gmra.mxu1 %v3014_v23 }
 0x117   : > { %v618_v54 = vpop.f32.mrf.mxu2  ;;  %v879_v45 = vpop.f32.mrf.mxu3 }
 0x118   : > { %v3400_v2 = vadd.f32 %v879_v45, %v610_v63  ;;  %1445 = vmatmul.f32.gmra.mxu0 %v3052_v3  ;;  %v3932_v45 = vand.u32 4294901760, %v3105_v53 }
 0x11a   : > { %3929 = vst [vmem:[#allocation41_spill] sm:$0xff] %v3400_v2 }
 0x11b   : > { %v3403_v61 = vpop.f32.mrf.mxu1 }
 0x11c   : > { %1006 = vmatmul.f32.gmra.mxu2 %v3105_v53  ;;  %1200 = vmatmul.f32.gmra.mxu3 %v3930_v52 }
 0x11d   : > { %v3408_v39 = vpop.f32.mrf.mxu0 }
 0x11e   : > { %1606 = vmatmul.f32.gmra.mxu1 %v3052_v3 }
 0x11f   : > { %v626_v19 = vpop.f32.mrf.mxu2  ;;  %v883_v55 = vpop.f32.mrf.mxu3 }
 0x120   : > { %v3411_v23 = vadd.f32 %v883_v55, %v618_v54  ;;  %1449 = vmatmul.f32.gmra.mxu0 %v3088_v22  ;;  %v3934_v55 = vand.u32 4294901760, %v3142_v37 }
 0x122   : > { %3931 = vst [vmem:[#allocation42_spill] sm:$0xff] %v3411_v23 }
 0x123   : > { %v3414_v63 = vpop.f32.mrf.mxu1 }
 0x124   : > { %1011 = vmatmul.f32.gmra.mxu2 %v3142_v37  ;;  %1206 = vmatmul.f32.gmra.mxu3 %v3932_v45 }
 0x125   : > { %v3419_v2 = vpop.f32.mrf.mxu0 }
 0x126   : > { %1610 = vmatmul.f32.gmra.mxu1 %v3088_v22 }
 0x127   : > { %v634_v36 = vpop.f32.mrf.mxu2  ;;  %v887_v52 = vpop.f32.mrf.mxu3 }
 0x128   : > { %v3422_v3 = vadd.f32 %v887_v52, %v626_v19  ;;  %1453 = vmatmul.f32.gmra.mxu0 %v3126_v24  ;;  %v3936_v52 = vand.u32 4294901760, %v3174_v20 }
 0x12a   : > { %3933 = vst [vmem:[#allocation43_spill] sm:$0xff] %v3422_v3 }
 0x12b   : > { %v3425_v54 = vpop.f32.mrf.mxu1 }
 0x12c   : > { %1016 = vmatmul.f32.gmra.mxu2 %v3174_v20  ;;  %1212 = vmatmul.f32.gmra.mxu3 %v3934_v55 }
 0x12d   : > { %v3430_v23 = vpop.f32.mrf.mxu0 }
 0x12e   : > { %1614 = vmatmul.f32.gmra.mxu1 %v3126_v24 }
 0x12f   : > { %v642_v53 = vpop.f32.mrf.mxu2  ;;  %v891_v45 = vpop.f32.mrf.mxu3 }
 0x130   : > { %v3433_v22 = vadd.f32 %v891_v45, %v634_v36  ;;  %1457 = vmatmul.f32.gmra.mxu0 %v3160_v26  ;;  %v3938_v45 = vand.u32 4294901760, %v3196_v60 }
 0x132   : > { %3935 = vst [vmem:[#allocation44_spill] sm:$0xff] %v3433_v22 }
 0x133   : > { %v3436_v19 = vpop.f32.mrf.mxu1 }
 0x134   : > { %1021 = vmatmul.f32.gmra.mxu2 %v3196_v60  ;;  %1218 = vmatmul.f32.gmra.mxu3 %v3936_v52 }
 0x135   : > { %v3441_v3 = vpop.f32.mrf.mxu0 }
 0x136   : > { %1618 = vmatmul.f32.gmra.mxu1 %v3160_v26 }
 0x137   : > { %v650_v37 = vpop.f32.mrf.mxu2  ;;  %v895_v55 = vpop.f32.mrf.mxu3 }
 0x138   : > { %v3444_v24 = vadd.f32 %v895_v55, %v642_v53  ;;  %1461 = vmatmul.f32.gmra.mxu0 %v3186_v38  ;;  %v3940_v55 = vand.u32 4294901760, %v3218_v40 }
 0x13a   : > { %3937 = vst [vmem:[#allocation45_spill] sm:$0xff] %v3444_v24 }
 0x13b   : > { %v3447_v36 = vpop.f32.mrf.mxu1 }
 0x13c   : > { %1026 = vmatmul.f32.gmra.mxu2 %v3218_v40  ;;  %1224 = vmatmul.f32.gmra.mxu3 %v3938_v45 }
 0x13d   : > { %v3452_v22 = vpop.f32.mrf.mxu0 }
 0x13e   : > { %1622 = vmatmul.f32.gmra.mxu1 %v3186_v38 }
 0x13f   : > { %v658_v20 = vpop.f32.mrf.mxu2  ;;  %v899_v52 = vpop.f32.mrf.mxu3 }
 0x140   : > { %v3455_v26 = vadd.f32 %v899_v52, %v650_v37  ;;  %1465 = vmatmul.f32.gmra.mxu0 %v3207_v58  ;;  %v3942_v52 = vand.u32 4294901760, %v3240_v62 }
 0x142   : > { %3939 = vst [vmem:[#allocation46_spill] sm:$0xff] %v3455_v26 }
 0x143   : > { %v3458_v53 = vpop.f32.mrf.mxu1 }
 0x144   : > { %1031 = vmatmul.f32.gmra.mxu2 %v3240_v62  ;;  %1230 = vmatmul.f32.gmra.mxu3 %v3940_v55 }
 0x145   : > { %v3463_v24 = vpop.f32.mrf.mxu0 }
 0x146   : > { %1626 = vmatmul.f32.gmra.mxu1 %v3207_v58 }
 0x147   : > { %v666_v60 = vpop.f32.mrf.mxu2  ;;  %v903_v45 = vpop.f32.mrf.mxu3 }
 0x148   : > { %v3466_v38 = vadd.f32 %v903_v45, %v658_v20  ;;  %1469 = vmatmul.f32.gmra.mxu0 %v3230_v14  ;;  %v3944_v45 = vand.u32 4294901760, %v3262_v57 }
 0x14a   : > { %3941 = vst [vmem:[#allocation47_spill] sm:$0xff] %v3466_v38 }
 0x14b   : > { %v3469_v37 = vpop.f32.mrf.mxu1 }
 0x14c   : > { %1036 = vmatmul.f32.gmra.mxu2 %v3262_v57  ;;  %1236 = vmatmul.f32.gmra.mxu3 %v3942_v52 }
 0x14d   : > { %v3474_v26 = vpop.f32.mrf.mxu0 }
 0x14e   : > { %1630 = vmatmul.f32.gmra.mxu1 %v3230_v14 }
 0x14f   : > { %v674_v40 = vpop.f32.mrf.mxu2  ;;  %v907_v55 = vpop.f32.mrf.mxu3 }
 0x150   : > { %v3477_v58 = vadd.f32 %v907_v55, %v666_v60  ;;  %1473 = vmatmul.f32.gmra.mxu0 %v3251_v32  ;;  %v3946_v55 = vand.u32 4294901760, %v3284_v51 }
 0x152   : > { %3943 = vst [vmem:[#allocation48_spill] sm:$0xff] %v3477_v58 }
 0x153   : > { %v3480_v20 = vpop.f32.mrf.mxu1 }
 0x154   : > { %1041 = vmatmul.f32.gmra.mxu2 %v3284_v51  ;;  %1242 = vmatmul.f32.gmra.mxu3 %v3944_v45 }
 0x155   : > { %v3485_v38 = vpop.f32.mrf.mxu0 }
 0x156   : > { %1634 = vmatmul.f32.gmra.mxu1 %v3251_v32 }
 0x157   : > { %v682_v62 = vpop.f32.mrf.mxu2  ;;  %v911_v52 = vpop.f32.mrf.mxu3 }
 0x158   : > { %v3488_v14 = vadd.f32 %v911_v52, %v674_v40  ;;  %1477 = vmatmul.f32.gmra.mxu0 %v3274_v49  ;;  %v3948_v52 = vand.u32 4294901760, %v3306_v27 }
 0x15a   : > { %3945 = vst [vmem:[#allocation49_spill] sm:$0xff] %v3488_v14 }
 0x15b   : > { %v3491_v60 = vpop.f32.mrf.mxu1 }
 0x15c   : > { %1046 = vmatmul.f32.gmra.mxu2 %v3306_v27  ;;  %1248 = vmatmul.f32.gmra.mxu3 %v3946_v55 }
 0x15d   : > { %v3496_v58 = vpop.f32.mrf.mxu0 }
 0x15e   : > { %1638 = vmatmul.f32.gmra.mxu1 %v3274_v49 }
 0x15f   : > { %v690_v57 = vpop.f32.mrf.mxu2  ;;  %v915_v45 = vpop.f32.mrf.mxu3 }
 0x160   : > { %v3499_v32 = vadd.f32 %v915_v45, %v682_v62  ;;  %1481 = vmatmul.f32.gmra.mxu0 %v3295_v6  ;;  %v3951_v45 = vand.u32 4294901760, %v3325_v35 }
 0x162   : > { %3947 = vst [vmem:[#allocation50_spill] sm:$0xff] %v3499_v32 }
 0x163   : > { %v3502_v40 = vpop.f32.mrf.mxu1 }
 0x164   : > { %1051 = vmatmul.f32.gmra.mxu2 %v3325_v35  ;;  %1254 = vmatmul.f32.gmra.mxu3 %v3948_v52  ;;  %v3953_v35 = vand.u32 4294901760, %v2853_v8 }
 0x165   : > { %v3507_v14 = vpop.f32.mrf.mxu0 }
 0x166   : > { %1642 = vmatmul.f32.gmra.mxu1 %v3295_v6 }
 0x167   : > { %v698_v51 = vpop.f32.mrf.mxu2  ;;  %v919_v55 = vpop.f32.mrf.mxu3 }
 0x168   : > { %v3510_v49 = vadd.f32 %v919_v55, %v690_v57  ;;  %1485 = vmatmul.f32.gmra.mxu0 %v3317_v28  ;;  %v800_v55 = vadd.f32 %v3344_v9, %v3340_v50 }
 0x16a   : > { %3949 = vst [vmem:[#allocation51_spill] sm:$0xff] %v3510_v49 }
 0x16b   : > { %v3513_v62 = vpop.f32.mrf.mxu1 }
 0x16c   : > { %3950 = vst [vmem:[#allocation52_spill] sm:$0xff] %v3513_v62  ;;  %1056 = vmatmul.f32.gmra.mxu2 %v2853_v8  ;;  %1260 = vmatmul.f32.gmra.mxu3 %v3951_v45  ;;  %v804_v8 = vadd.f32 %v3355_v33, %v3349_v44 }
 0x16d   : > { %v1426_v27 = vpop.f32.mrf.mxu0 }
 0x16e   : > { %1646 = vmatmul.f32.gmra.mxu1 %v3317_v28 }
 0x16f   : > { %v923_v52 = vpop.f32.mrf.mxu3  ;;  %v977_v32 = vpop.f32.mrf.mxu2 }
 0x170   : > { %v3519_v6 = vadd.f32 %v923_v52, %v698_v51  ;;  %1489 = vmatmul.f32.gmra.mxu0 %v2824_v56  ;;  %v978_v49 = vadd.f32 %v977_v32, %v800_v55 }
 0x172   : > { %3952 = vst [vmem:[#allocation53_spill] sm:$0xff] %v3519_v6  ;;  %v3533_v6 = vld [vmem:[%s3359_s28] ss:$0 sm:$0xff] }
 0x173   : > { %v1587_v57 = vpop.f32.mrf.mxu1 }
 0x174   : > { %1061 = vmatmul.f32.gmra.mxu2 %v2907_v12  ;;  %1266 = vmatmul.f32.gmra.mxu3 %v3953_v35 }
 0x175   : > { %v1430_v45 = vpop.f32.mrf.mxu0 }
 0x176   : > { %1650 = vmatmul.f32.gmra.mxu1 %v2824_v56  ;;  %v3954_v56 = vand.u32 4294901760, %v2907_v12  ;;  %v808_v12 = vadd.f32 %v3370_v0, %v3364_v43 }
 0x177   : > { %v982_v28 = vpop.f32.mrf.mxu2  ;;  %v1171_v62 = vpop.f32.mrf.mxu3 }
 0x178   : > { %v1172_v51 = vadd.f32 %v1171_v62, %v978_v49  ;;  %1493 = vmatmul.f32.gmra.mxu0 %v2879_v47  ;;  %v983_v55 = vadd.f32 %v982_v28, %v804_v8 }
 0x17a   : > { %v1427_v52 = vadd.f32 %v1426_v27, %v1172_v51 }
 0x17b   : > { %v1591_v50 = vpop.f32.mrf.mxu1 }
 0x17c   : > { %v1588_v9 = vadd.f32 %v1587_v57, %v1427_v52  ;;  %1066 = vmatmul.f32.gmra.mxu2 %v2945_v48  ;;  %1272 = vmatmul.f32.gmra.mxu3 %v3954_v56  ;;  %v3956_v56 = vand.u32 4294901760, %v2971_v13 }
 0x17d   : > { %v1434_v32 = vpop.f32.mrf.mxu0 }
 0x17e   : > { %v1817_v49 = vadd.f32 %v3533_v6, %v1588_v9  ;;  %1654 = vmatmul.f32.gmra.mxu1 %v2879_v47  ;;  %v3955_v47 = vand.u32 4294901760, %v2945_v48 }
 0x17f   : > { %v987_v62 = vpop.f32.mrf.mxu2  ;;  %v1177_v27 = vpop.f32.mrf.mxu3 }
 0x180   : > { %1849 = vst [vmem:[%s3542_s6] sm:$0xff] %v1817_v49  ;;  %v1178_v33 = vadd.f32 %v1177_v27, %v983_v55  ;;  %1497 = vmatmul.f32.gmra.mxu0 %v2924_v1  ;;  %v988_v51 = vadd.f32 %v987_v62, %v808_v12 }
 0x182   : > { %v1431_v44 = vadd.f32 %v1430_v45, %v1178_v33  ;;  %v816_v33 = vadd.f32 %v3392_v42, %v3386_v29 }
 0x183   : > { %v1595_v57 = vpop.f32.mrf.mxu1 }
 0x184   : > { %v1592_v35 = vadd.f32 %v1591_v50, %v1431_v44  ;;  %1071 = vmatmul.f32.gmra.mxu2 %v2971_v13  ;;  %1278 = vmatmul.f32.gmra.mxu3 %v3955_v47  ;;  %v812_v50 = vadd.f32 %v3381_v46, %v3375_v21  ;;  %v3957_v44 = vand.u32 4294901760, %v3005_v30 }
 0x185   : > { %v1438_v28 = vpop.f32.mrf.mxu0 }
 0x186   : > { %v1818_v52 = vadd.f32 %v3533_v6, %v1592_v35  ;;  %1658 = vmatmul.f32.gmra.mxu1 %v2924_v1 }
 0x187   : > { %v992_v8 = vpop.f32.mrf.mxu2  ;;  %v1183_v9 = vpop.f32.mrf.mxu3 }
 0x188   : > { %1850 = vst [vmem:[%s3542_s6 + $0x8] sm:$0xff] %v1818_v52  ;;  %v1184_v45 = vadd.f32 %v1183_v9, %v988_v51  ;;  %1501 = vmatmul.f32.gmra.mxu0 %v2957_v34  ;;  %v993_v1 = vadd.f32 %v992_v8, %v812_v50  ;;  %v820_v51 = vadd.f32 %v3403_v61, %v3397_v25  ;;  %v3958_v52 = vand.u32 4294901760, %v3048_v10 }
 0x189   : > { %v824_v50 = vadd.f32 %v3414_v63, %v3408_v39 }
 0x18a   : > { %v1435_v43 = vadd.f32 %v1434_v32, %v1184_v45 }
 0x18b   : > { %v1599_v0 = vpop.f32.mrf.mxu1 }
 0x18c   : > { %v1596_v48 = vadd.f32 %v1595_v57, %v1435_v43  ;;  %1076 = vmatmul.f32.gmra.mxu2 %v3005_v30  ;;  %1284 = vmatmul.f32.gmra.mxu3 %v3956_v56 }
 0x18d   : > { %v1442_v55 = vpop.f32.mrf.mxu0 }
 0x18e   : > { %v1819_v49 = vadd.f32 %v3533_v6, %v1596_v48  ;;  %1662 = vmatmul.f32.gmra.mxu1 %v2957_v34  ;;  %v3959_v48 = vand.u32 4294901760, %v3078_v18 }
 0x18f   : > { %v997_v62 = vpop.f32.mrf.mxu2  ;;  %v1189_v27 = vpop.f32.mrf.mxu3 }
 0x190   : > { %1851 = vst [vmem:[%s3542_s6 + $0x10] sm:$0xff] %v1819_v49  ;;  %v1190_v32 = vadd.f32 %v1189_v27, %v993_v1  ;;  %1505 = vmatmul.f32.gmra.mxu0 %v2988_v15  ;;  %v998_v34 = vadd.f32 %v997_v62, %v816_v33  ;;  %v828_v27 = vadd.f32 %v3425_v54, %v3419_v2 }
 0x192   : > { %v1439_v21 = vadd.f32 %v1438_v28, %v1190_v32  ;;  %v3960_v32 = vand.u32 4294901760, %v3122_v7 }
 0x193   : > { %v1603_v46 = vpop.f32.mrf.mxu1 }
 0x194   : > { %v1600_v13 = vadd.f32 %v1599_v0, %v1439_v21  ;;  %1081 = vmatmul.f32.gmra.mxu2 %v3048_v10  ;;  %1290 = vmatmul.f32.gmra.mxu3 %v3957_v44 }
 0x195   : > { %v1446_v57 = vpop.f32.mrf.mxu0 }
 0x196   : > { %v1820_v12 = vadd.f32 %v3533_v6, %v1600_v13  ;;  %1666 = vmatmul.f32.gmra.mxu1 %v2988_v15 }
 0x197   : > { %v1002_v35 = vpop.f32.mrf.mxu2  ;;  %v1195_v47 = vpop.f32.mrf.mxu3 }
 0x198   : > { %1852 = vst [vmem:[%s3542_s6 + $0x18] sm:$0xff] %v1820_v12  ;;  %v1196_v28 = vadd.f32 %v1195_v47, %v998_v34  ;;  %1509 = vmatmul.f32.gmra.mxu0 %v3028_v31  ;;  %v1003_v15 = vadd.f32 %v1002_v35, %v820_v51  ;;  %v832_v34 = vadd.f32 %v3436_v19, %v3430_v23  ;;  %v3962_v12 = vld [vmem:[#allocation28_spill] sm:$0xff]  ;;  %v3963_v35 = vand.u32 4294901760, %v3150_v59 }
 0x19a   : > { %v1443_v29 = vadd.f32 %v1442_v55, %v1196_v28 }
 0x19b   : > { %v1607_v42 = vpop.f32.mrf.mxu1 }
 0x19c   : > { %v1604_v30 = vadd.f32 %v1603_v46, %v1443_v29  ;;  %1086 = vmatmul.f32.gmra.mxu2 %v3078_v18  ;;  %1296 = vmatmul.f32.gmra.mxu3 %v3958_v52  ;;  %v836_v52 = vadd.f32 %v3447_v36, %v3441_v3 }
 0x19d   : > { %v1450_v8 = vpop.f32.mrf.mxu0 }
 0x19e   : > { %v1821_v9 = vadd.f32 %v3533_v6, %v1604_v30  ;;  %1670 = vmatmul.f32.gmra.mxu1 %v3028_v31  ;;  %v3964_v30 = vld [vmem:[#allocation27_spill] sm:$0xff] }
 0x19f   : > { %v1007_v45 = vpop.f32.mrf.mxu2  ;;  %v1201_v43 = vpop.f32.mrf.mxu3 }
 0x1a0   : > { %1853 = vst [vmem:[%s3542_s6 + $0x20] sm:$0xff] %v1821_v9  ;;  %v1202_v0 = vadd.f32 %v1201_v43, %v1003_v15  ;;  %1513 = vmatmul.f32.gmra.mxu0 %v3059_v11  ;;  %v1008_v31 = vadd.f32 %v1007_v45, %v824_v50  ;;  %v3966_v15 = vand.u32 4294901760, %v3962_v12  ;;  %v3967_v50 = vld [vmem:[#allocation29_spill] sm:$0xff] }
 0x1a2   : > { %v1447_v25 = vadd.f32 %v1446_v57, %v1202_v0  ;;  %v3961_v57 = vld [vmem:[#allocation26_spill] sm:$0xff] }
 0x1a3   : > { %v1611_v61 = vpop.f32.mrf.mxu1 }
 0x1a4   : > { %v1608_v10 = vadd.f32 %v1607_v42, %v1447_v25  ;;  %1091 = vmatmul.f32.gmra.mxu2 %v3122_v7  ;;  %1302 = vmatmul.f32.gmra.mxu3 %v3959_v48 }
 0x1a5   : > { %v1454_v56 = vpop.f32.mrf.mxu0 }
 0x1a6   : > { %v1822_v55 = vadd.f32 %v3533_v6, %v1608_v10  ;;  %1674 = vmatmul.f32.gmra.mxu1 %v3059_v11  ;;  %v840_v10 = vadd.f32 %v3458_v53, %v3452_v22 }
 0x1a7   : > { %v1012_v1 = vpop.f32.mrf.mxu2  ;;  %v1207_v49 = vpop.f32.mrf.mxu3 }
 0x1a8   : > { %1854 = vst [vmem:[%s3542_s6 + $0x28] sm:$0xff] %v1822_v55  ;;  %v1208_v62 = vadd.f32 %v1207_v49, %v1008_v31  ;;  %1517 = vmatmul.f32.gmra.mxu0 %v3102_v4  ;;  %v1013_v11 = vadd.f32 %v1012_v1, %v828_v27  ;;  %v3970_v27 = vld [vmem:[#allocation31_spill] sm:$0xff] }
 0x1aa   : > { %v1451_v39 = vadd.f32 %v1450_v8, %v1208_v62  ;;  %v3965_v8 = vld [vmem:[#allocation30_spill] sm:$0xff] }
 0x1ab   : > { %v1615_v63 = vpop.f32.mrf.mxu1  ;;  %v3969_v31 = vand.u32 4294901760, %v3965_v8 }
 0x1ac   : > { %v1612_v18 = vadd.f32 %v1611_v61, %v1451_v39  ;;  %1096 = vmatmul.f32.gmra.mxu2 %v3150_v59  ;;  %1308 = vmatmul.f32.gmra.mxu3 %v3960_v32 }
 0x1ad   : > { %v1458_v21 = vpop.f32.mrf.mxu0 }
 0x1ae   : > { %v1823_v46 = vadd.f32 %v3533_v6, %v1612_v18  ;;  %1678 = vmatmul.f32.gmra.mxu1 %v3102_v4  ;;  %v844_v18 = vadd.f32 %v3469_v37, %v3463_v24 }
 0x1af   : > { %v1017_v33 = vpop.f32.mrf.mxu2  ;;  %v1213_v13 = vpop.f32.mrf.mxu3 }
 0x1b0   : > { %1855 = vst [vmem:[%s3542_s6 + $0x30] sm:$0xff] %v1823_v46  ;;  %v1214_v44 = vadd.f32 %v1213_v13, %v1013_v11  ;;  %1521 = vmatmul.f32.gmra.mxu0 %v3961_v57  ;;  %v1018_v4 = vadd.f32 %v1017_v33, %v832_v34 }
 0x1b2   : > { %v1455_v2 = vadd.f32 %v1454_v56, %v1214_v44  ;;  %v3968_v56 = vld [vmem:[#allocation32_spill] sm:$0xff] }
 0x1b3   : > { %v1619_v54 = vpop.f32.mrf.mxu1  ;;  %v3972_v11 = vand.u32 4294901760, %v3968_v56 }
 0x1b4   : > { %v1616_v7 = vadd.f32 %v1615_v63, %v1455_v2  ;;  %1101 = vmatmul.f32.gmra.mxu2 %v3962_v12  ;;  %1314 = vmatmul.f32.gmra.mxu3 %v3963_v35 }
 0x1b5   : > { %v1462_v47 = vpop.f32.mrf.mxu0 }
 0x1b6   : > { %v1824_v28 = vadd.f32 %v3533_v6, %v1616_v7  ;;  %1682 = vmatmul.f32.gmra.mxu1 %v3961_v57  ;;  %v3973_v7 = vld [vmem:[#allocation34_spill] sm:$0xff] }
 0x1b7   : > { %v1022_v29 = vpop.f32.mrf.mxu2  ;;  %v1219_v42 = vpop.f32.mrf.mxu3 }
 0x1b8   : > { %1856 = vst [vmem:[%s3542_s6 + $0x38] sm:$0xff] %v1824_v28  ;;  %v1220_v51 = vadd.f32 %v1219_v42, %v1018_v4  ;;  %1525 = vmatmul.f32.gmra.mxu0 %v3964_v30  ;;  %v1023_v45 = vadd.f32 %v1022_v29, %v836_v52 }
 0x1ba   : > { %v1459_v23 = vadd.f32 %v1458_v21, %v1220_v51  ;;  %v3971_v21 = vld [vmem:[#allocation33_spill] sm:$0xff]  ;;  %v852_v51 = vadd.f32 %v3491_v60, %v3485_v38 }
 0x1bb   : > { %v1623_v19 = vpop.f32.mrf.mxu1  ;;  %v3974_v12 = vand.u32 4294901760, %v3971_v21 }
 0x1bc   : > { %v1620_v59 = vadd.f32 %v1619_v54, %v1459_v23  ;;  %1106 = vmatmul.f32.gmra.mxu2 %v3965_v8  ;;  %1320 = vmatmul.f32.gmra.mxu3 %v3966_v15  ;;  %v848_v54 = vadd.f32 %v3480_v20, %v3474_v26  ;;  %v3975_v23 = vand.u32 4294901760, %v3973_v7 }
 0x1bd   : > { %v1466_v9 = vpop.f32.mrf.mxu0 }
 0x1be   : > { %v1825_v43 = vadd.f32 %v3533_v6, %v1620_v59  ;;  %1686 = vmatmul.f32.gmra.mxu1 %v3964_v30 }
 0x1bf   : > { %v1027_v0 = vpop.f32.mrf.mxu2  ;;  %v1225_v25 = vpop.f32.mrf.mxu3 }
 0x1c0   : > { %1857 = vst [vmem:[%s3542_s6 + $0x40] sm:$0xff] %v1825_v43  ;;  %v1226_v61 = vadd.f32 %v1225_v25, %v1023_v45  ;;  %1529 = vmatmul.f32.gmra.mxu0 %v3967_v50  ;;  %v1028_v1 = vadd.f32 %v1027_v0, %v840_v10  ;;  %v3976_v43 = vld [vmem:[#allocation36_spill] sm:$0xff]  ;;  %v3977_v0 = vand.u32 4294901760, %v3288_v41  ;;  %v3978_v10 = vld [vmem:[#allocation35_spill] sm:$0xff] }
 0x1c2   : > { %v1463_v3 = vadd.f32 %v1462_v47, %v1226_v61 }
 0x1c3   : > { %v1627_v36 = vpop.f32.mrf.mxu1 }
 0x1c4   : > { %v1624_v48 = vadd.f32 %v1623_v19, %v1463_v3  ;;  %1111 = vmatmul.f32.gmra.mxu2 %v3968_v56  ;;  %1326 = vmatmul.f32.gmra.mxu3 %v3969_v31  ;;  %v3980_v31 = vand.u32 4294901760, %v3976_v43 }
 0x1c5   : > { %v1470_v55 = vpop.f32.mrf.mxu0 }
 0x1c6   : > { %v1826_v49 = vadd.f32 %v3533_v6, %v1624_v48  ;;  %1690 = vmatmul.f32.gmra.mxu1 %v3967_v50  ;;  %v3979_v48 = vld [vmem:[#allocation52_spill] sm:$0xff] }
 0x1c7   : > { %v1032_v62 = vpop.f32.mrf.mxu2  ;;  %v1231_v39 = vpop.f32.mrf.mxu3  ;;  %v860_v56 = vadd.f32 %v3979_v48, %v3507_v14 }
 0x1c8   : > { %1858 = vst [vmem:[%s3542_s6 + $0x48] sm:$0xff] %v1826_v49  ;;  %v1232_v63 = vadd.f32 %v1231_v39, %v1028_v1  ;;  %1533 = vmatmul.f32.gmra.mxu0 %v3970_v27  ;;  %v1033_v33 = vadd.f32 %v1032_v62, %v844_v18 }
 0x1ca   : > { %v1467_v22 = vadd.f32 %v1466_v9, %v1232_v63  ;;  %v856_v9 = vadd.f32 %v3502_v40, %v3496_v58 }
 0x1cb   : > { %v1631_v53 = vpop.f32.mrf.mxu1 }
 0x1cc   : > { %v1628_v32 = vadd.f32 %v1627_v36, %v1467_v22  ;;  %1116 = vmatmul.f32.gmra.mxu2 %v3971_v21  ;;  %1332 = vmatmul.f32.gmra.mxu3 %v3972_v11 }
 0x1cd   : > { %v1474_v46 = vpop.f32.mrf.mxu0 }
 0x1ce   : > { %v1827_v13 = vadd.f32 %v3533_v6, %v1628_v32  ;;  %1694 = vmatmul.f32.gmra.mxu1 %v3970_v27 }
 0x1cf   : > { %v1037_v44 = vpop.f32.mrf.mxu2  ;;  %v1237_v57 = vpop.f32.mrf.mxu3 }
 0x1d0   : > { %1859 = vst [vmem:[%s3542_s6 + $0x50] sm:$0xff] %v1827_v13  ;;  %v1238_v2 = vadd.f32 %v1237_v57, %v1033_v33  ;;  %1537 = vmatmul.f32.gmra.mxu0 %v3233_v17  ;;  %v1038_v47 = vadd.f32 %v1037_v44, %v848_v54 }
 0x1d2   : > { %v1471_v24 = vadd.f32 %v1470_v55, %v1238_v2  ;;  %v3982_v2 = vld [vmem:[#allocation38_spill] sm:$0xff] }
 0x1d3   : > { %v1635_v37 = vpop.f32.mrf.mxu1 }
 0x1d4   : > { %v1632_v34 = vadd.f32 %v1631_v53, %v1471_v24  ;;  %1121 = vmatmul.f32.gmra.mxu2 %v3973_v7  ;;  %1338 = vmatmul.f32.gmra.mxu3 %v3974_v12  ;;  %v3981_v53 = vld [vmem:[#allocation37_spill] sm:$0xff] }
 0x1d5   : > { %v1478_v35 = vpop.f32.mrf.mxu0 }
 0x1d6   : > { %v1828_v4 = vadd.f32 %v3533_v6, %v1632_v34  ;;  %1698 = vmatmul.f32.gmra.mxu1 %v3233_v17 }
 0x1d7   : > { %v1042_v28 = vpop.f32.mrf.mxu2  ;;  %v1243_v29 = vpop.f32.mrf.mxu3 }
 0x1d8   : > { %1860 = vst [vmem:[%s3542_s6 + $0x58] sm:$0xff] %v1828_v4  ;;  %v1244_v42 = vadd.f32 %v1243_v29, %v1038_v47  ;;  %1541 = vmatmul.f32.gmra.mxu0 %v3259_v16  ;;  %v1043_v17 = vadd.f32 %v1042_v28, %v852_v51  ;;  %v3983_v28 = vld [vmem:[#allocation39_spill] sm:$0xff] }
 0x1da   : > { %v1475_v26 = vadd.f32 %v1474_v46, %v1244_v42 }
 0x1db   : > { %v1639_v20 = vpop.f32.mrf.mxu1 }
 0x1dc   : > { %v1636_v30 = vadd.f32 %v1635_v37, %v1475_v26  ;;  %1126 = vmatmul.f32.gmra.mxu2 %v3288_v41  ;;  %1344 = vmatmul.f32.gmra.mxu3 %v3975_v23 }
 0x1dd   : > { %v1482_v19 = vpop.f32.mrf.mxu0 }
 0x1de   : > { %v1829_v52 = vadd.f32 %v3533_v6, %v1636_v30  ;;  %1702 = vmatmul.f32.gmra.mxu1 %v3259_v16 }
 0x1df   : > { %v1047_v59 = vpop.f32.mrf.mxu2  ;;  %v1249_v8 = vpop.f32.mrf.mxu3 }
 0x1e0   : > { %1861 = vst [vmem:[%s3542_s6 + $0x60] sm:$0xff] %v1829_v52  ;;  %v1250_v15 = vadd.f32 %v1249_v8, %v1043_v17  ;;  %1545 = vmatmul.f32.gmra.mxu0 %v3277_v5  ;;  %v1048_v16 = vadd.f32 %v1047_v59, %v856_v9  ;;  %v3984_v52 = vld [vmem:[#allocation40_spill] sm:$0xff] }
 0x1e2   : > { %v1479_v38 = vadd.f32 %v1478_v35, %v1250_v15 }
 0x1e3   : > { %v1643_v60 = vpop.f32.mrf.mxu1 }
 0x1e4   : > { %v1640_v45 = vadd.f32 %v1639_v20, %v1479_v38  ;;  %1131 = vmatmul.f32.gmra.mxu2 %v3976_v43  ;;  %1350 = vmatmul.f32.gmra.mxu3 %v3977_v0 }
 0x1e5   : > { %v1486_v25 = vpop.f32.mrf.mxu0 }
 0x1e6   : > { %v1830_v61 = vadd.f32 %v3533_v6, %v1640_v45  ;;  %1706 = vmatmul.f32.gmra.mxu1 %v3277_v5 }
 0x1e7   : > { %v1052_v50 = vpop.f32.mrf.mxu2  ;;  %v1255_v3 = vpop.f32.mrf.mxu3 }
 0x1e8   : > { %1862 = vst [vmem:[%s3542_s6 + $0x68] sm:$0xff] %v1830_v61  ;;  %v1256_v36 = vadd.f32 %v1255_v3, %v1048_v16  ;;  %1549 = vmatmul.f32.gmra.mxu0 %v3978_v10  ;;  %v1053_v1 = vadd.f32 %v1052_v50, %v860_v56  ;;  %v3986_v56 = vld [vmem:[#allocation42_spill] sm:$0xff] }
 0x1ea   : > { %v1483_v58 = vadd.f32 %v1482_v19, %v1256_v36 }
 0x1eb   : > { %v1647_v40 = vpop.f32.mrf.mxu1 }
 0x1ec   : > { %v1644_v41 = vadd.f32 %v1643_v60, %v1483_v58  ;;  %1356 = vmatmul.f32.gmra.mxu3 %v3980_v31 }
 0x1ed   : > { %v1490_v55 = vpop.f32.mrf.mxu0 }
 0x1ee   : > { %v1831_v5 = vadd.f32 %v3533_v6, %v1644_v41  ;;  %1710 = vmatmul.f32.gmra.mxu1 %v3978_v10 }
 0x1ef   : > { %v1057_v49 = vpop.f32.mrf.mxu2  ;;  %v1261_v62 = vpop.f32.mrf.mxu3 }
 0x1f0   : > { %1863 = vst [vmem:[%s3542_s6 + $0x70] sm:$0xff] %v1831_v5  ;;  %v1262_v39 = vadd.f32 %v1261_v62, %v1053_v1  ;;  %v1058_v18 = vadd.f32 %v1057_v49, %v3981_v53 }
 0x1f2   : > { %v1487_v63 = vadd.f32 %v1486_v25, %v1262_v39  ;;  %v3985_v25 = vld [vmem:[#allocation41_spill] sm:$0xff] }
 0x1f3   : > { %v1651_v27 = vpop.f32.mrf.mxu1 }
 0x1f4   : > { %v1648_v22 = vadd.f32 %v1647_v40, %v1487_v63 }
 0x1f5   : > { %v1494_v14 = vpop.f32.mrf.mxu0 }
 0x1f6   : > { %v1832_v32 = vadd.f32 %v3533_v6, %v1648_v22 }
 0x1f7   : > { %v1062_v21 = vpop.f32.mrf.mxu2  ;;  %v1267_v11 = vpop.f32.mrf.mxu3 }
 0x1f8   : > { %1864 = vst [vmem:[%s3542_s6 + $0x78] sm:$0xff] %v1832_v32  ;;  %v1268_v46 = vadd.f32 %v1267_v11, %v1058_v18  ;;  %v1063_v24 = vadd.f32 %v1062_v21, %v3982_v2 }
 0x1fa   : > { %v1491_v33 = vadd.f32 %v1490_v55, %v1268_v46 }
 0x1fb   : > { %v1655_v13 = vpop.f32.mrf.mxu1 }
 0x1fc   : > { %v1652_v44 = vadd.f32 %v1651_v27, %v1491_v33  ;;  %v3987_v27 = vld [vmem:[#allocation43_spill] sm:$0xff] }
 0x1fd   : > { %v1498_v57 = vpop.f32.mrf.mxu0 }
 0x1fe   : > { %v1833_v37 = vadd.f32 %v3533_v6, %v1652_v44 }
 0x1ff   : > { %v1067_v54 = vpop.f32.mrf.mxu2  ;;  %v1273_v34 = vpop.f32.mrf.mxu3 }
 0x200   : > { %1865 = vst [vmem:[%s3542_s6 + $0x80] sm:$0xff] %v1833_v37  ;;  %v1274_v7 = vadd.f32 %v1273_v34, %v1063_v24  ;;  %v1068_v29 = vadd.f32 %v1067_v54, %v3983_v28 }
 0x202   : > { %v1495_v12 = vadd.f32 %v1494_v14, %v1274_v7 }
 0x203   : > { %v1659_v35 = vpop.f32.mrf.mxu1 }
 0x204   : > { %v1656_v47 = vadd.f32 %v1655_v13, %v1495_v12  ;;  %v3988_v13 = vld [vmem:[#allocation44_spill] sm:$0xff] }
 0x205   : > { %v1502_v4 = vpop.f32.mrf.mxu0 }
 0x206   : > { %v1834_v42 = vadd.f32 %v3533_v6, %v1656_v47 }
 0x207   : > { %v1072_v26 = vpop.f32.mrf.mxu2  ;;  %v1279_v20 = vpop.f32.mrf.mxu3 }
 0x208   : > { %1866 = vst [vmem:[%s3542_s6 + $0x88] sm:$0xff] %v1834_v42  ;;  %v1280_v51 = vadd.f32 %v1279_v20, %v1068_v29  ;;  %v1073_v59 = vadd.f32 %v1072_v26, %v3984_v52 }
 0x20a   : > { %v1499_v30 = vadd.f32 %v1498_v57, %v1280_v51 }
 0x20b   : > { %v1663_v23 = vpop.f32.mrf.mxu1 }
 0x20c   : > { %v1660_v19 = vadd.f32 %v1659_v35, %v1499_v30  ;;  %v3989_v35 = vld [vmem:[#allocation45_spill] sm:$0xff] }
 0x20d   : > { %v1506_v17 = vpop.f32.mrf.mxu0 }
 0x20e   : > { %v1835_v8 = vadd.f32 %v3533_v6, %v1660_v19 }
 0x20f   : > { %v1077_v15 = vpop.f32.mrf.mxu2  ;;  %v1285_v38 = vpop.f32.mrf.mxu3 }
 0x210   : > { %1867 = vst [vmem:[%s3542_s6 + $0x90] sm:$0xff] %v1835_v8  ;;  %v1286_v60 = vadd.f32 %v1285_v38, %v1073_v59  ;;  %v1078_v16 = vadd.f32 %v1077_v15, %v3985_v25 }
 0x212   : > { %v1503_v9 = vadd.f32 %v1502_v4, %v1286_v60 }
 0x213   : > { %v1667_v45 = vpop.f32.mrf.mxu1 }
 0x214   : > { %v1664_v43 = vadd.f32 %v1663_v23, %v1503_v9  ;;  %v3990_v23 = vld [vmem:[#allocation46_spill] sm:$0xff]  ;;  %v3991_v9 = vld [vmem:[#allocation47_spill] sm:$0xff] }
 0x215   : > { %v1510_v0 = vpop.f32.mrf.mxu0 }
 0x216   : > { %v1836_v61 = vadd.f32 %v3533_v6, %v1664_v43 }
 0x217   : > { %v1082_v50 = vpop.f32.mrf.mxu2  ;;  %v1291_v3 = vpop.f32.mrf.mxu3 }
 0x218   : > { %1868 = vst [vmem:[%s3542_s6 + $0x98] sm:$0xff] %v1836_v61  ;;  %v1292_v36 = vadd.f32 %v1291_v3, %v1078_v16  ;;  %v1083_v41 = vadd.f32 %v1082_v50, %v3986_v56 }
 0x21a   : > { %v1507_v10 = vadd.f32 %v1506_v17, %v1292_v36 }
 0x21b   : > { %v1671_v58 = vpop.f32.mrf.mxu1 }
 0x21c   : > { %v1668_v40 = vadd.f32 %v1667_v45, %v1507_v10  ;;  %v3992_v10 = vld [vmem:[#allocation48_spill] sm:$0xff] }
 0x21d   : > { %v1514_v48 = vpop.f32.mrf.mxu0 }
 0x21e   : > { %v1837_v31 = vadd.f32 %v3533_v6, %v1668_v40 }
 0x21f   : > { %v1087_v55 = vpop.f32.mrf.mxu2  ;;  %v1297_v1 = vpop.f32.mrf.mxu3 }
 0x220   : > { %1869 = vst [vmem:[%s3542_s6 + $0xa0] sm:$0xff] %v1837_v31  ;;  %v1298_v5 = vadd.f32 %v1297_v1, %v1083_v41  ;;  %v1088_v22 = vadd.f32 %v1087_v55, %v3987_v27 }
 0x222   : > { %v1511_v49 = vadd.f32 %v1510_v0, %v1298_v5 }
 0x223   : > { %v1675_v62 = vpop.f32.mrf.mxu1 }
 0x224   : > { %v1672_v39 = vadd.f32 %v1671_v58, %v1511_v49  ;;  %v3993_v49 = vld [vmem:[#allocation49_spill] sm:$0xff] }
 0x225   : > { %v1518_v63 = vpop.f32.mrf.mxu0 }
 0x226   : > { %v1838_v14 = vadd.f32 %v3533_v6, %v1672_v39 }
 0x227   : > { %v1092_v53 = vpop.f32.mrf.mxu2  ;;  %v1303_v18 = vpop.f32.mrf.mxu3 }
 0x228   : > { %1870 = vst [vmem:[%s3542_s6 + $0xa8] sm:$0xff] %v1838_v14  ;;  %v1304_v32 = vadd.f32 %v1303_v18, %v1088_v22  ;;  %v1093_v44 = vadd.f32 %v1092_v53, %v3988_v13 }
 0x22a   : > { %v1515_v21 = vadd.f32 %v1514_v48, %v1304_v32 }
 0x22b   : > { %v1679_v11 = vpop.f32.mrf.mxu1 }
 0x22c   : > { %v1676_v46 = vadd.f32 %v1675_v62, %v1515_v21  ;;  %v3995_v21 = vld [vmem:[#allocation50_spill] sm:$0xff] }
 0x22d   : > { %v1522_v33 = vpop.f32.mrf.mxu0 }
 0x22e   : > { %v1839_v57 = vadd.f32 %v3533_v6, %v1676_v46 }
 0x22f   : > { %v1097_v2 = vpop.f32.mrf.mxu2  ;;  %v1309_v24 = vpop.f32.mrf.mxu3 }
 0x230   : > { %1871 = vst [vmem:[%s3542_s6 + $0xb0] sm:$0xff] %v1839_v57  ;;  %v1310_v37 = vadd.f32 %v1309_v24, %v1093_v44  ;;  %v1098_v47 = vadd.f32 %v1097_v2, %v3989_v35 }
 0x232   : > { %v1519_v54 = vadd.f32 %v1518_v63, %v1310_v37  ;;  %v3997_v37 = vld [vmem:[#allocation51_spill] sm:$0xff] }
 0x233   : > { %v1683_v34 = vpop.f32.mrf.mxu1 }
 0x234   : > { %v1680_v7 = vadd.f32 %v1679_v11, %v1519_v54 }
 0x235   : > { %v1526_v12 = vpop.f32.mrf.mxu0 }
 0x236   : > { %v1840_v4 = vadd.f32 %v3533_v6, %v1680_v7 }
 0x237   : > { %v1102_v28 = vpop.f32.mrf.mxu2  ;;  %v1315_v29 = vpop.f32.mrf.mxu3 }
 0x238   : > { %1872 = vst [vmem:[%s3542_s6 + $0xb8] sm:$0xff] %v1840_v4  ;;  %v1316_v42 = vadd.f32 %v1315_v29, %v1098_v47  ;;  %v1103_v19 = vadd.f32 %v1102_v28, %v3990_v23  ;;  %v3998_v29 = vld [vmem:[#allocation53_spill] sm:$0xff] }
 0x23a   : > { %v1523_v26 = vadd.f32 %v1522_v33, %v1316_v42 }
 0x23b   : > { %v1687_v20 = vpop.f32.mrf.mxu1 }
 0x23c   : > { %v1684_v51 = vadd.f32 %v1683_v34, %v1523_v26 }
 0x23d   : > { %v1530_v30 = vpop.f32.mrf.mxu0 }
 0x23e   : > { %v1841_v17 = vadd.f32 %v3533_v6, %v1684_v51 }
 0x23f   : > { %v1107_v52 = vpop.f32.mrf.mxu2  ;;  %v1321_v59 = vpop.f32.mrf.mxu3 }
 0x240   : > { %1873 = vst [vmem:[%s3542_s6 + $0xc0] sm:$0xff] %v1841_v17  ;;  %v1322_v8 = vadd.f32 %v1321_v59, %v1103_v19  ;;  %v1108_v45 = vadd.f32 %v1107_v52, %v3991_v9 }
 0x242   : > { %v1527_v15 = vadd.f32 %v1526_v12, %v1322_v8 }
 0x243   : > { %v1691_v38 = vpop.f32.mrf.mxu1 }
 0x244   : > { %v1688_v60 = vadd.f32 %v1687_v20, %v1527_v15 }
 0x245   : > { %v1534_v0 = vpop.f32.mrf.mxu0 }
 0x246   : > { %v1842_v43 = vadd.f32 %v3533_v6, %v1688_v60 }
 0x247   : > { %v1112_v25 = vpop.f32.mrf.mxu2  ;;  %v1327_v16 = vpop.f32.mrf.mxu3 }
 0x248   : > { %1874 = vst [vmem:[%s3542_s6 + $0xc8] sm:$0xff] %v1842_v43  ;;  %v1328_v61 = vadd.f32 %v1327_v16, %v1108_v45  ;;  %v1113_v58 = vadd.f32 %v1112_v25, %v3992_v10 }
 0x24a   : > { %v1531_v50 = vadd.f32 %v1530_v30, %v1328_v61 }
 0x24b   : > { %v1695_v3 = vpop.f32.mrf.mxu1 }
 0x24c   : > { %v1692_v36 = vadd.f32 %v1691_v38, %v1531_v50 }
 0x24d   : > { %v1538_v31 = vpop.f32.mrf.mxu0 }
 0x24e   : > { %v1843_v40 = vadd.f32 %v3533_v6, %v1692_v36 }
 0x24f   : > { %v1117_v48 = vpop.f32.mrf.mxu2  ;;  %v1333_v56 = vpop.f32.mrf.mxu3 }
 0x250   : > { %1875 = vst [vmem:[%s3542_s6 + $0xd0] sm:$0xff] %v1843_v40  ;;  %v1334_v41 = vadd.f32 %v1333_v56, %v1113_v58  ;;  %v1118_v62 = vadd.f32 %v1117_v48, %v3993_v49 }
 0x252   : > { %v1535_v55 = vadd.f32 %v1534_v0, %v1334_v41 }
 0x253   : > { %v1699_v1 = vpop.f32.mrf.mxu1 }
 0x254   : > { %v1696_v5 = vadd.f32 %v1695_v3, %v1535_v55 }
 0x255   : > { %v1542_v53 = vpop.f32.mrf.mxu0 }
 0x256   : > { %v1844_v39 = vadd.f32 %v3533_v6, %v1696_v5 }
 0x257   : > { %v1122_v63 = vpop.f32.mrf.mxu2  ;;  %v1339_v27 = vpop.f32.mrf.mxu3 }
 0x258   : > { %1876 = vst [vmem:[%s3542_s6 + $0xd8] sm:$0xff] %v1844_v39  ;;  %v1340_v22 = vadd.f32 %v1339_v27, %v1118_v62  ;;  %v1123_v11 = vadd.f32 %v1122_v63, %v3995_v21 }
 0x25a   : > { %v1539_v14 = vadd.f32 %v1538_v31, %v1340_v22 }
 0x25b   : > { %v1703_v32 = vpop.f32.mrf.mxu1 }
 0x25c   : > { %v1700_v18 = vadd.f32 %v1699_v1, %v1539_v14 }
 0x25d   : > { %v1546_v24 = vpop.f32.mrf.mxu0 }
 0x25e   : > { %v1845_v46 = vadd.f32 %v3533_v6, %v1700_v18 }
 0x25f   : > { %v1345_v33 = vpop.f32.mrf.mxu3  ;;  %v1127_v44 = vpop.f32.mrf.mxu2 }
 0x260   : > { %1877 = vst [vmem:[%s3542_s6 + $0xe0] sm:$0xff] %v1845_v46  ;;  %v1346_v13 = vadd.f32 %v1345_v33, %v1123_v11  ;;  %v1128_v54 = vadd.f32 %v1127_v44, %v3997_v37 }
 0x262   : > { %v1543_v57 = vadd.f32 %v1542_v53, %v1346_v13 }
 0x263   : > { %v1707_v12 = vpop.f32.mrf.mxu1 }
 0x264   : > { %v1704_v2 = vadd.f32 %v1703_v32, %v1543_v57 }
 0x265   : > { %v1550_v51 = vpop.f32.mrf.mxu0 }
 0x266   : > { %v1846_v34 = vadd.f32 %v3533_v6, %v1704_v2 }
 0x267   : > { %v1351_v7 = vpop.f32.mrf.mxu3  ;;  %v1132_v4 = vpop.f32.mrf.mxu2 }
 0x268   : > { %1878 = vst [vmem:[%s3542_s6 + $0xe8] sm:$0xff] %v1846_v34  ;;  %v1352_v35 = vadd.f32 %v1351_v7, %v1128_v54  ;;  %v1133_v42 = vadd.f32 %v1132_v4, %v3998_v29 }
 0x26a   : > { %v1547_v47 = vadd.f32 %v1546_v24, %v1352_v35 }
 0x26b   : > { %v1711_v23 = vpop.f32.mrf.mxu1 }
 0x26c   : > { %v1708_v28 = vadd.f32 %v1707_v12, %v1547_v47 }
 0x26e   : > { %v1847_v26 = vadd.f32 %v3533_v6, %v1708_v28 }
 0x26f   : > { %v1357_v20 = vpop.f32.mrf.mxu3 }
 0x270   : > { %1879 = vst [vmem:[%s3542_s6 + $0xf0] sm:$0xff] %v1847_v26  ;;  %v1358_v30 = vadd.f32 %v1357_v20, %v1133_v42 }
 0x272   : > { %v1551_v19 = vadd.f32 %v1550_v51, %v1358_v30 }
 0x274   : > { %v1712_v17 = vadd.f32 %v1711_v23, %v1551_v19 }
 0x276   : > { %v1848_v52 = vadd.f32 %v3533_v6, %v1712_v17 }
 0x278   : > { %1880 = vst [vmem:[%s3542_s6 + $0xf8] sm:$0xff] %v1848_v52 }
 0x279   : > { %2344 = shalt.err (!%p2341_p8)
}
 0x27a   : > { %s2472_s30 = smov 128   ;;  %s2473_s4 = smov 384  }
 0x27b   : > { %s2474_s6 = smov 8  }
 0x27c   : > { %2090 = dma.vmem_to_hbm [thread:$0]  (%p2666_p3), %s1897_s20, 4096, %s1899_s11, %s1882_s15, %s2472_s30, %s2473_s4, %s2474_s6  }
 0x27d PF: > { %s4001_s8 = sld [smem:[#allocation13_spill]]  ;;  %p2107_p10 = scmp.ge.s32.totalorder %s2467_s25, 2 }
 0x27f   : > { %p2103_p11 = pnand %p2107_p10, %p2673_p5 }
 0x281   : > { %p2104_p12 = pneg %p2103_p11 }
 0x283   : > { %s1913_s27 = sand.u32 1, %s4001_s8  }
 0x284   : > { %s1914_s9 = scalar_lea.sflag [#allocation5], %s1913_s27 }
 0x285   : > { %2410 = dma.done.wait (%p2104_p12), %s1914_s9, 4096  }
 0x286   : > { %2412 = vsyncadd (%p2104_p12), %s1914_s9, 4294963200  ;;  %s22_s25 = sadd.s32 1, %s2467_s25   ;;  %s4004_s21 = sld [smem:[#allocation14_spill]] }
 0x287   : > { %p3743_p13 = scmp.ge.s32.totalorder %s22_s25, 8   ;;  %s4005_s14 = sld [smem:[#allocation23_spill]] }
 0x288   : > { %s4006_s29 = sld [smem:[#allocation21_spill]]  ;;  %s4012_s12 = smov %s2419_s13 }
 0x289   : > { %s4007_s26 = sld [smem:[#allocation15_spill]]  ;;  %s4014_s15 = smov %s2431_s16 }
 0x28a   : > { %s4008_s20 = sld [smem:[#allocation22_spill]]  ;;  %s4015_s16 = smov %s2435_s17 }
 0x28b   : > { %s4009_s22 = sld [smem:[#allocation18_spill]]  ;;  %s4017_s18 = smov %s2443_s19 }
 0x28c   : > { %s4010_s11 = sld [smem:[#allocation19_spill]]  ;;  %s4013_s13 = smov %s4004_s21 }
 0x28d   : > { %s4011_s24 = sld [smem:[#allocation20_spill]]  ;;  %s4019_s21 = smov %s2459_s23 }
 0x28e   : > { %s4016_s17 = smov %s4006_s29  ;;  %21 = sbr.rel (!%p3743_p13) target bundleno = 15 (0xf), region = 109 }
 0x28f   : > { %s4018_s19 = smov %s4007_s26 }
 0x292   : > { %s4020_s23 = smov %s4010_s11 }
 0x293   :  { %1920 = vsyncpa [#allocation4], 1 }
 0x294   :  { %1922 = vsyncpa [#allocation4 + $0x1], 1 }
 0x295   :  { %1923 = vsyncpa [#allocation7], 1 }
 0x296   :  { %1925 = vsyncpa [#allocation7 + $0x1], 1 }
 0x297   :  { %1926 = vsyncpa [#allocation5], 1 }
 0x298   :  { %1928 = vsyncpa [#allocation5 + $0x1], 1 }

</bundles_post_ra>
